<compile_context>
chip_gen: v7x
topology: tpu7x:2x2x1
jax: 0.10.0
libtpu: 0.0.40
codegen_flags: <defaults>
</compile_context>

<pallas_src>
import math
import functools

import jax
import jax.numpy as jnp
from jax.experimental import pallas as pl
from jax.experimental.pallas import tpu as pltpu

LAYER_NORM_EPS = 1e-5
NEGINF = -1e20


def _layer_norm(t, gamma, beta):
    mu = jnp.mean(t, axis=-1, keepdims=True)
    var = jnp.mean(jnp.square(t - mu), axis=-1, keepdims=True)
    return (t - mu) * jax.lax.rsqrt(var + LAYER_NORM_EPS) * gamma + beta


def _nonlinear(x, activation):
    if activation == 'relu':
        return jnp.maximum(x, 0.0)
    elif activation == 'gelu':
        return 0.5 * x * (1.0 + jax.lax.erf(x / math.sqrt(2.0)))
    raise ValueError(f"unknown activation {activation}")


# ----------------------------------------------------------------------------
# Kernel
# ----------------------------------------------------------------------------
def _encoder_layer_kernel(
    xfull_ref, xt_ref, kbias_ref, mcol_ref,
    wqkv_ref, bqkv_ref, wo_ref, bo_ref,
    w1_ref, b1_ref, w2_ref, b2_ref,
    g1_ref, be1_ref, g2_ref, be2_ref,
    o_ref,
    qkv_ref,
    *, n_heads: int, variant, activation: str,
    tq: int, tk: int, nk: int, rc: int, fc: int):
    T = xfull_ref.shape[1]
    D = xfull_ref.shape[2]
    F = w1_ref.shape[1]
    dh = D // n_heads

    qi = pl.program_id(1)

    # ---- fused QKV projection: once per batch element, reused by all tiles --
    # Row-chunked so the (rc, 3D) f32 dot+bias intermediate stays small; the
    # bf16 result is written straight into the single (T, 3D) scratch slab.
    # The 1/sqrt(dh) scale is pre-folded into the Q weights/bias.
    @pl.when(qi == 0)
    def _():
        def project(i, carry):
            r0 = pl.multiple_of(i * rc, rc)
            xb = xfull_ref[0, pl.ds(r0, rc), :]                  # (rc, D) bf16
            if variant == 'prelayernorm':
                xb = _layer_norm(xb.astype(jnp.float32),
                                 g1_ref[...], be1_ref[...]).astype(jnp.bfloat16)
            chunk = jnp.dot(xb, wqkv_ref[...],
                            preferred_element_type=jnp.float32) + bqkv_ref[...]
            qkv_ref[pl.ds(r0, rc), :] = chunk.astype(jnp.bfloat16)
            return carry
        jax.lax.fori_loop(0, T // rc, project, 0)

    # ---- self-attention for this query tile ----
    q0 = pl.multiple_of(qi * tq, tq)
    attn_acc = None
    # Static unroll over heads: after key tiling the per-head live state is a
    # small (tq, tk) f32 block, so vreg pressure stays bounded for typical
    # encoder head counts.  TODO(synk): head-major scratch + fori_loop for
    # very large n_heads.
    for h in range(n_heads):
        lo = h * dh
        q_h = qkv_ref[pl.ds(q0, tq), lo:lo + dh]                 # (tq, dh) bf16

        if nk == 1:
            # Single-shot softmax over the full key axis (short sequences).
            k_h = qkv_ref[:, D + lo:D + lo + dh]                 # (T, dh) bf16
            v_h = qkv_ref[:, 2 * D + lo:2 * D + lo + dh]         # (T, dh) bf16
            s = jax.lax.dot_general(q_h, k_h, (((1,), (1,)), ((), ())),
                                    preferred_element_type=jnp.float32)
            s = s + kbias_ref[0, 0]                              # additive -1e20 mask
            s = s - jnp.max(s, axis=-1, keepdims=True)
            e = jnp.exp(s)
            p = e / jnp.sum(e, axis=-1, keepdims=True)           # exact divide
            av = jnp.dot(p.astype(jnp.bfloat16), v_h,
                         preferred_element_type=jnp.float32)     # (tq, dh) f32
        else:
            # Flash-style online softmax over key tiles of size tk.
            def kc_body(kc, carry):
                m, l, acc = carry
                k0 = pl.multiple_of(kc * tk, tk)
                k_c = qkv_ref[pl.ds(k0, tk), D + lo:D + lo + dh]
                v_c = qkv_ref[pl.ds(k0, tk), 2 * D + lo:2 * D + lo + dh]
                s = jax.lax.dot_general(q_h, k_c, (((1,), (1,)), ((), ())),
                                        preferred_element_type=jnp.float32)
                s = s + kbias_ref[0, kc]
                m_new = jnp.maximum(m, jnp.max(s, axis=-1, keepdims=True))
                alpha = jnp.exp(m - m_new)
                p = jnp.exp(s - m_new)
                l_new = alpha * l + jnp.sum(p, axis=-1, keepdims=True)
                acc_new = alpha * acc + jnp.dot(p.astype(jnp.bfloat16), v_c,
                                                preferred_element_type=jnp.float32)
                return m_new, l_new, acc_new

            m0 = jnp.full((tq, 1), -jnp.inf, jnp.float32)
            l0 = jnp.zeros((tq, 1), jnp.float32)
            a0 = jnp.zeros((tq, dh), jnp.float32)
            m, l, acc = jax.lax.fori_loop(0, nk, kc_body, (m0, l0, a0))
            av = acc / l
        # NOTE: fully-masked query rows get a uniform attention distribution
        # (all keys biased by -1e20); this is benign because the final output
        # is multiplied by the query-mask column, exactly like the reference.

        # Fold the output projection per head:  attn @ wo == sum_h av_h @ wo[h]
        # (no concat scratch, no lane-misaligned partial stores for dh < 128).
        # av is rounded to bf16 for the MXU; f32 accumulation throughout.
        part = jnp.dot(av.astype(jnp.bfloat16), wo_ref[h],
                       preferred_element_type=jnp.float32)       # (tq, D)
        attn_acc = part if attn_acc is None else attn_acc + part

    attn_out = attn_acc + bo_ref[...]                            # (tq, D) f32

    x_tile = xt_ref[0]                                           # residual (f32)
    tensor = x_tile + attn_out                                   # dropout p=0
    if variant in ('aiayn', 'xlm'):
        tensor = _layer_norm(tensor, g1_ref[...], be1_ref[...])

    # ---- FFN, chunked over the hidden dimension (value accumulation) ----
    residual = tensor
    if variant == 'prelayernorm':
        tensor = _layer_norm(tensor, g2_ref[...], be2_ref[...])
    t_bf = tensor.astype(jnp.bfloat16)
    ffn_acc = None
    for f0 in range(0, F, fc):
        h1 = jnp.dot(t_bf, w1_ref[:, f0:f0 + fc],
                     preferred_element_type=jnp.float32) + b1_ref[:, f0:f0 + fc]
        h1 = _nonlinear(h1, activation).astype(jnp.bfloat16)
        part = jnp.dot(h1, w2_ref[f0:f0 + fc, :],
                       preferred_element_type=jnp.float32)
        ffn_acc = part if ffn_acc is None else ffn_acc + part
    tensor = residual + ffn_acc + b2_ref[...]                    # dropout p=0
    if variant in ('aiayn', 'xlm'):
        tensor = _layer_norm(tensor, g2_ref[...], be2_ref[...])

    # final: tensor *= mask.unsqueeze(-1)
    tensor = tensor * mcol_ref[0]                                # (tq, 1) broadcast
    o_ref[0] = tensor.astype(o_ref.dtype)


# ----------------------------------------------------------------------------
# Tiling heuristics (generation-aware)
# ----------------------------------------------------------------------------
def _device_kind():
    try:
        return jax.devices()[0].device_kind.lower()
    except Exception:
        return ""


def _vmem_limit_bytes(kind):
    if "v7" in kind:
        return 56 * 1024 * 1024       # v7x: 64 MiB physical VMEM per TensorCore
    if any(g in kind for g in ("v4", "v5", "v6")):
        return 96 * 1024 * 1024       # 128 MiB physical VMEM parts
    return 64 * 1024 * 1024


def _pick_q_tile(T, kind):
    cap = 128 if "v5" in kind else 256   # v5e MXU is 128-wide; v6e/v7x are 256-wide
    if T <= cap:
        return T
    for tq in (256, 128, 64, 32, 16):
        if tq <= cap and T % tq == 0:
            return tq
    return T


def _pick_key_tile(T):
    if T <= 512:
        return T
    for tk in (512, 256, 128):
        if T % tk == 0:
            return tk
    return T


def _pick_row_chunk(T):
    if T <= 256:
        return T
    for rc in (256, 128, 64, 32, 16):
        if T % rc == 0:
            return rc
    return T


def _pick_ffn_chunk(F):
    if F <= 2048:
        return F
    for c in (2048, 1024, 512, 256, 128):
        if F % c == 0:
            return c
    return F


# ----------------------------------------------------------------------------
# Wrapper
# ----------------------------------------------------------------------------
def transformer_encoder_layer(x, mask, params, *, n_heads, variant=None,
                              activation='relu', q_tile=None, key_tile=None,
                              row_chunk=None, ffn_chunk=None):
    """x: [B, T, D] float32; mask: [B, T] (1.0 = attend, 0.0 = blocked)."""
    B, T, D = x.shape
    F = params['w1'].shape[1]
    assert D % n_heads == 0
    dh = D // n_heads
    scale = math.sqrt(dh)

    kind = _device_kind()
    TQ = q_tile if q_tile is not None else _pick_q_tile(T, kind)
    TK = key_tile if key_tile is not None else _pick_key_tile(T)
    RC = row_chunk if row_chunk is not None else _pick_row_chunk(T)
    FC = ffn_chunk if ffn_chunk is not None else _pick_ffn_chunk(F)
    assert T % TQ == 0 and T % TK == 0 and T % RC == 0 and F % FC == 0
    NQ = T // TQ
    NK = T // TK

    # Fused QKV weights for the MXU (bf16); fold 1/sqrt(dh) into Q weights/bias.
    wqkv = jnp.concatenate(
        [params['wq'] / scale, params['wk'], params['wv']], axis=1).astype(jnp.bfloat16)
    bqkv = jnp.concatenate(
        [params['bq'] / scale, params['bk'], params['bv']]).reshape(1, 3 * D).astype(jnp.float32)
    # Output projection stored head-major (H, dh, D): kernel computes
    # sum_h av_h @ wo[h], avoiding lane-misaligned per-head stores.
    wo_h = params['wo'].reshape(n_heads, dh, D).astype(jnp.bfloat16)
    w1 = params['w1'].astype(jnp.bfloat16)
    w2 = params['w2'].astype(jnp.bfloat16)

    x_bf = x.astype(jnp.bfloat16)   # full-seq copy, used only for the QKV matmul
    maskf = mask.astype(jnp.float32)
    # Additive key-mask bias (0 attend / -1e20 blocked), pre-chunked over key
    # tiles so the kernel indexes chunks on a leading (untiled) axis.
    key_bias = jnp.where(maskf == 0.0, jnp.float32(NEGINF),
                         jnp.float32(0.0)).reshape(B, NK, 1, TK)
    mask_col = maskf.reshape(B, T, 1)          # final per-query output mask

    row = lambda v: v.reshape(1, -1).astype(jnp.float32)

    def const_spec(shape):
        # Constant weights/biases: block index never changes across the grid,
        # so one buffer suffices — default double-buffering would only double
        # their VMEM residency (critical on v7x's 64 MiB VMEM).
        zeros = (0,) * len(shape)
        return pl.BlockSpec(shape, lambda b, q: zeros,
                            pipeline_mode=pl.Buffered(1))

    kernel = functools.partial(
        _encoder_layer_kernel, n_heads=n_heads, variant=variant,
        activation=activation, tq=TQ, tk=TK, nk=NK, rc=RC, fc=FC)

    return pl.pallas_call(
        kernel,
        out_shape=jax.ShapeDtypeStruct((B, T, D), x.dtype),
        grid=(B, NQ),
        in_specs=[
            # bf16 full-sequence view: read only at q-tile 0 for the QKV matmul
            pl.BlockSpec((1, T, D), lambda b, q: (b, 0, 0)),
            # f32 query tile: residual / layernorm path
            pl.BlockSpec((1, TQ, D), lambda b, q: (b, q, 0)),
            pl.BlockSpec((1, NK, 1, TK), lambda b, q: (b, 0, 0, 0)),  # key-mask bias
            pl.BlockSpec((1, TQ, 1), lambda b, q: (b, q, 0)),         # query-mask column
            const_spec((D, 3 * D)), const_spec((1, 3 * D)),           # wqkv, bqkv
            const_spec((n_heads, dh, D)), const_spec((1, D)),         # wo (head-major), bo
            const_spec((D, F)), const_spec((1, F)),                   # w1, b1
            const_spec((F, D)), const_spec((1, D)),                   # w2, b2
            const_spec((1, D)), const_spec((1, D)),                   # norm1 gamma/beta
            const_spec((1, D)), const_spec((1, D)),                   # norm2 gamma/beta
        ],
        out_specs=pl.BlockSpec((1, TQ, D), lambda b, q: (b, q, 0)),
        scratch_shapes=[
            # Single fused-QKV slab; persists across the query tiles of one
            # batch element (q axis is "arbitrary", b axis is "parallel").
            pltpu.VMEM((T, 3 * D), jnp.bfloat16),
        ],
        compiler_params=pltpu.CompilerParams(
            dimension_semantics=("parallel", "arbitrary"),
            vmem_limit_bytes=_vmem_limit_bytes(kind)),
    )(x_bf, x, key_bias, mask_col,
      wqkv, bqkv,
      wo_h, row(params['bo']),
      w1, row(params['b1']),
      w2, row(params['b2']),
      row(params['g1']), row(params['be1']),
      row(params['g2']), row(params['be2']))


# ----------------------------------------------------------------------------
# Pure-JAX f32 reference (mirrors the PyTorch module) and parameter init
# ----------------------------------------------------------------------------
def encoder_layer_reference(x, mask, params, *, n_heads, variant=None,
                            activation='relu'):
    B, T, D = x.shape
    dh = D // n_heads
    scale = math.sqrt(dh)

    def ln(t, g, b):
        mu = jnp.mean(t, -1, keepdims=True)
        var = jnp.mean(jnp.square(t - mu), -1, keepdims=True)
        return (t - mu) * jax.lax.rsqrt(var + LAYER_NORM_EPS) * g + b

    def heads(t):
        return t.reshape(B, T, n_heads, dh).transpose(0, 2, 1, 3)

    residual = x
    t = ln(x, params['g1'], params['be1']) if variant == 'prelayernorm' else x
    q = heads((t @ params['wq'] + params['bq']) / scale)
    k = heads(t @ params['wk'] + params['bk'])
    v = heads(t @ params['wv'] + params['bv'])
    scores = jnp.einsum('bhqd,bhkd->bhqk', q, k)
    scores = jnp.where(mask[:, None, None, :] == 0.0, jnp.float32(NEGINF), scores)
    w = jax.nn.softmax(scores, axis=-1)
    av = jnp.einsum('bhqk,bhkd->bhqd', w, v)
    att = av.transpose(0, 2, 1, 3).reshape(B, T, D) @ params['wo'] + params['bo']
    t = residual + att
    if variant in ('aiayn', 'xlm'):
        t = ln(t, params['g1'], params['be1'])
    residual = t
    t2 = ln(t, params['g2'], params['be2']) if variant == 'prelayernorm' else t
    h1 = t2 @ params['w1'] + params['b1']
    if activation == 'relu':
        h1 = jnp.maximum(h1, 0.0)
    else:
        h1 = 0.5 * h1 * (1.0 + jax.lax.erf(h1 / math.sqrt(2.0)))
    f = h1 @ params['w2'] + params['b2']
    t = residual + f
    if variant in ('aiayn', 'xlm'):
        t = ln(t, params['g2'], params['be2'])
    return t * mask[:, :, None]


def init_params(key, dim, ffn_dim):
    """Linear weights stored pre-transposed to (in, out): y = x @ W + b."""
    ks = jax.random.split(key, 12)

    def xavier_normal(k, fan_in, fan_out):
        std = math.sqrt(2.0 / (fan_in + fan_out))
        return std * jax.random.normal(k, (fan_in, fan_out), jnp.float32)

    def xavier_uniform(k, fan_in, fan_out):
        a = math.sqrt(6.0 / (fan_in + fan_out))
        return jax.random.uniform(k, (fan_in, fan_out), jnp.float32, -a, a)

    def bias(k, fan_in, size):
        bound = 1.0 / math.sqrt(fan_in)
        return jax.random.uniform(k, (size,), jnp.float32, -bound, bound)

    return dict(
        wq=xavier_normal(ks[0], dim, dim), bq=bias(ks[1], dim, dim),
        wk=xavier_normal(ks[2], dim, dim), bk=bias(ks[3], dim, dim),
        wv=xavier_normal(ks[4], dim, dim), bv=bias(ks[5], dim, dim),
        wo=xavier_normal(ks[6], dim, dim), bo=bias(ks[7], dim, dim),
        w1=xavier_uniform(ks[8], dim, ffn_dim), b1=bias(ks[9], dim, ffn_dim),
        w2=xavier_uniform(ks[10], ffn_dim, dim), b2=bias(ks[11], ffn_dim, dim),
        g1=jnp.ones((dim,), jnp.float32), be1=jnp.zeros((dim,), jnp.float32),
        g2=jnp.ones((dim,), jnp.float32), be2=jnp.zeros((dim,), jnp.float32),
    )


if __name__ == "__main__":
    key = jax.random.PRNGKey(0)
    k1, k2, k3, k4 = jax.random.split(key, 4)

    # --- config 1: module defaults (variant=None, relu), single-tile path ---
    B, T, D, FFN, H = 2, 8, 32, 64, 4
    x = jax.random.normal(k1, (B, T, D), jnp.float32)
    mask = jnp.ones((B, T), jnp.float32).at[1, 6:].set(0.0)
    params = init_params(k2, D, FFN)

    out = transformer_encoder_layer(x, mask, params, n_heads=H, variant=None)
    out = jax.block_until_ready(out)
    ref = encoder_layer_reference(x, mask, params, n_heads=H, variant=None)
    assert out.shape == (B, T, D)
    assert bool(jnp.all(jnp.isfinite(out)))
    assert bool(jnp.allclose(out, ref, atol=1e-1, rtol=1e-1)), \
        float(jnp.max(jnp.abs(out - ref)))

    # --- config 2: exercises the tiled paths (q tiles, key-tiled online
    #     softmax, row-chunked QKV projection) and the 'aiayn' post-LN ---
    B2, T2, D2, F2, H2 = 1, 64, 32, 64, 4
    x2 = jax.random.normal(k3, (B2, T2, D2), jnp.float32)
    mask2 = jnp.ones((B2, T2), jnp.float32).at[0, 50:].set(0.0)
    params2 = init_params(k4, D2, F2)
    out2 = transformer_encoder_layer(
        x2, mask2, params2, n_heads=H2, variant='aiayn',
        q_tile=32, key_tile=16, row_chunk=32)
    out2 = jax.block_until_ready(out2)
    ref2 = encoder_layer_reference(x2, mask2, params2, n_heads=H2, variant='aiayn')
    assert bool(jnp.allclose(out2, ref2, atol=1e-1, rtol=1e-1)), \
        float(jnp.max(jnp.abs(out2 - ref2)))

    print("KERNEL_OK")
</pallas_src>

<mosaic_0001>
module attributes {stable_mosaic.version = 11 : i64} {
  func.func @_encoder_layer_kernel(%arg0: i32, %arg1: i32, %arg2: memref<1x8x32xbf16, #tpu.memory_space<vmem>>, %arg3: memref<1x8x32xf32, #tpu.memory_space<vmem>>, %arg4: memref<1x1x1x8xf32, #tpu.memory_space<vmem>>, %arg5: memref<1x8x1xf32, #tpu.memory_space<vmem>>, %arg6: memref<32x96xbf16, #tpu.memory_space<vmem>>, %arg7: memref<1x96xf32, #tpu.memory_space<vmem>>, %arg8: memref<4x8x32xbf16, #tpu.memory_space<vmem>>, %arg9: memref<1x32xf32, #tpu.memory_space<vmem>>, %arg10: memref<32x64xbf16, #tpu.memory_space<vmem>>, %arg11: memref<1x64xf32, #tpu.memory_space<vmem>>, %arg12: memref<64x32xbf16, #tpu.memory_space<vmem>>, %arg13: memref<1x32xf32, #tpu.memory_space<vmem>>, %arg14: memref<1x32xf32, #tpu.memory_space<vmem>>, %arg15: memref<1x32xf32, #tpu.memory_space<vmem>>, %arg16: memref<1x32xf32, #tpu.memory_space<vmem>>, %arg17: memref<1x32xf32, #tpu.memory_space<vmem>>, %arg18: memref<1x8x32xf32, #tpu.memory_space<vmem>>, %arg19: memref<8x96xbf16, #tpu.memory_space<vmem>>) attributes {dimension_semantics = [#tpu.dimension_semantics<parallel>, #tpu.dimension_semantics<arbitrary>], iteration_bounds = array<i64: 2, 1>, scalar_prefetch = 0 : i64, scratch_operands = 1 : i64, tpu.core_type = #tpu.core_type<tc>, window_params = [{transform_indices = @transform_0, window_bounds = array<i64: 1, 8, 32>}, {transform_indices = @transform_1, window_bounds = array<i64: 1, 8, 32>}, {transform_indices = @transform_2, window_bounds = array<i64: 1, 1, 1, 8>}, {transform_indices = @transform_3, window_bounds = array<i64: 1, 8, 1>}, {pipeline_mode = #tpu.pipeline_mode<synchronous>, transform_indices = @transform_4, window_bounds = array<i64: 32, 96>}, {pipeline_mode = #tpu.pipeline_mode<synchronous>, transform_indices = @transform_5, window_bounds = array<i64: 1, 96>}, {pipeline_mode = #tpu.pipeline_mode<synchronous>, transform_indices = @transform_6, window_bounds = array<i64: 4, 8, 32>}, {pipeline_mode = #tpu.pipeline_mode<synchronous>, transform_indices = @transform_7, window_bounds = array<i64: 1, 32>}, {pipeline_mode = #tpu.pipeline_mode<synchronous>, transform_indices = @transform_8, window_bounds = array<i64: 32, 64>}, {pipeline_mode = #tpu.pipeline_mode<synchronous>, transform_indices = @transform_9, window_bounds = array<i64: 1, 64>}, {pipeline_mode = #tpu.pipeline_mode<synchronous>, transform_indices = @transform_10, window_bounds = array<i64: 64, 32>}, {pipeline_mode = #tpu.pipeline_mode<synchronous>, transform_indices = @transform_11, window_bounds = array<i64: 1, 32>}, {pipeline_mode = #tpu.pipeline_mode<synchronous>, transform_indices = @transform_12, window_bounds = array<i64: 1, 32>}, {pipeline_mode = #tpu.pipeline_mode<synchronous>, transform_indices = @transform_13, window_bounds = array<i64: 1, 32>}, {pipeline_mode = #tpu.pipeline_mode<synchronous>, transform_indices = @transform_14, window_bounds = array<i64: 1, 32>}, {pipeline_mode = #tpu.pipeline_mode<synchronous>, transform_indices = @transform_15, window_bounds = array<i64: 1, 32>}, {transform_indices = @transform_16, window_bounds = array<i64: 1, 8, 32>}]} {
    %c0_i32 = arith.constant 0 : i32
    %0 = arith.cmpi eq, %arg1, %c0_i32 : i32
    %1 = arith.extui %0 : i1 to i32
    %c0_i32_0 = arith.constant 0 : i32
    %2 = arith.cmpi ne, %1, %c0_i32_0 : i32
    scf.if %2 {
      %c0_i32_75 = arith.constant 0 : i32
      %c8_i32_76 = arith.constant 8 : i32
      %132 = arith.muli %c0_i32_75, %c8_i32_76 : i32
      %133 = tpu.assume_multiple %132, 8 : i32
      %c0_77 = arith.constant 0 : index
      %134 = arith.index_cast %133 : i32 to index
      %c0_78 = arith.constant 0 : index
      %135 = vector.load %arg2[%c0_77, %134, %c0_78] : memref<1x8x32xbf16, #tpu.memory_space<vmem>>, vector<1x8x32xbf16>
      %136 = vector.shape_cast %135 : vector<1x8x32xbf16> to vector<8x32xbf16>
      %c0_79 = arith.constant 0 : index
      %c0_80 = arith.constant 0 : index
      %137 = vector.load %arg6[%c0_79, %c0_80] : memref<32x96xbf16, #tpu.memory_space<vmem>>, vector<32x96xbf16>
      %cst_81 = arith.constant dense<0.000000e+00> : vector<8x96xf32>
      %138 = tpu.matmul %136, %137, %cst_81 {dimension_numbers = #tpu.dot_dimension_numbers<[1], [0], [0], [1], [0, 0, 1, 1], [], []>} : vector<8x32xbf16>, vector<32x96xbf16>, vector<8x96xf32> -> vector<8x96xf32>
      %c0_82 = arith.constant 0 : index
      %c0_83 = arith.constant 0 : index
      %139 = vector.load %arg7[%c0_82, %c0_83] : memref<1x96xf32, #tpu.memory_space<vmem>>, vector<1x96xf32>
      %140 = vector.broadcast %139 : vector<1x96xf32> to vector<8x96xf32>
      %141 = arith.addf %138, %140 : vector<8x96xf32>
      %142 = arith.truncf %141 : vector<8x96xf32> to vector<8x96xbf16>
      %143 = arith.index_cast %133 : i32 to index
      %c0_84 = arith.constant 0 : index
      %144 = vector.load %arg19[%143, %c0_84] : memref<8x96xbf16, #tpu.memory_space<vmem>>, vector<8x96xbf16>
      tpu.vector_store %arg19[%143, %c0_84], %142 {strides = array<i32>} : memref<8x96xbf16, #tpu.memory_space<vmem>>, vector<8x96xbf16>,
      %c1_i32 = arith.constant 1 : i32
    } else {
    }
    %c8_i32 = arith.constant 8 : i32
    %3 = arith.muli %arg1, %c8_i32 : i32
    %4 = tpu.assume_multiple %3, 8 : i32
    %5 = arith.index_cast %4 : i32 to index
    %c0 = arith.constant 0 : index
    %6 = vector.load %arg19[%5, %c0] : memref<8x96xbf16, #tpu.memory_space<vmem>>, vector<8x8xbf16>
    %c0_1 = arith.constant 0 : index
    %c32 = arith.constant 32 : index
    %7 = vector.load %arg19[%c0_1, %c32] : memref<8x96xbf16, #tpu.memory_space<vmem>>, vector<8x8xbf16>
    %c0_2 = arith.constant 0 : index
    %c64 = arith.constant 64 : index
    %8 = vector.load %arg19[%c0_2, %c64] : memref<8x96xbf16, #tpu.memory_space<vmem>>, vector<8x8xbf16>
    %cst = arith.constant dense<0.000000e+00> : vector<8x8xf32>
    %9 = tpu.matmul %6, %7, %cst {dimension_numbers = #tpu.dot_dimension_numbers<[1], [1], [0], [0], [0, 0, 1, 0], [], []>} : vector<8x8xbf16>, vector<8x8xbf16>, vector<8x8xf32> -> vector<8x8xf32>
    %c0_3 = arith.constant 0 : index
    %c0_4 = arith.constant 0 : index
    %c0_5 = arith.constant 0 : index
    %c0_6 = arith.constant 0 : index
    %10 = vector.load %arg4[%c0_3, %c0_4, %c0_5, %c0_6] : memref<1x1x1x8xf32, #tpu.memory_space<vmem>>, vector<1x1x1x8xf32>
    %11 = vector.shape_cast %10 : vector<1x1x1x8xf32> to vector<1x8xf32>
    %12 = vector.broadcast %11 : vector<1x8xf32> to vector<8x8xf32>
    %13 = arith.addf %9, %12 : vector<8x8xf32>
    %cst_7 = arith.constant dense<0xFF800000> : vector<8xf32>
    %14 = vector.multi_reduction <maximumf>, %13, %cst_7 [1] : vector<8x8xf32> to vector<8xf32>
    %15 = vector.shape_cast %14 : vector<8xf32> to vector<8x1xf32>
    %16 = vector.broadcast %15 : vector<8x1xf32> to vector<8x8xf32>
    %17 = arith.subf %13, %16 : vector<8x8xf32>
    %18 = math.exp %17 : vector<8x8xf32>
    %cst_8 = arith.constant dense<0.000000e+00> : vector<8xf32>
    %19 = vector.multi_reduction <add>, %18, %cst_8 [1] : vector<8x8xf32> to vector<8xf32>
    %20 = vector.shape_cast %19 : vector<8xf32> to vector<8x1xf32>
    %21 = vector.broadcast %20 : vector<8x1xf32> to vector<8x8xf32>
    %22 = arith.divf %18, %21 : vector<8x8xf32>
    %23 = arith.truncf %22 : vector<8x8xf32> to vector<8x8xbf16>
    %cst_9 = arith.constant dense<0.000000e+00> : vector<8x8xf32>
    %24 = tpu.matmul %23, %8, %cst_9 {dimension_numbers = #tpu.dot_dimension_numbers<[1], [0], [0], [1], [0, 0, 1, 1], [], []>} : vector<8x8xbf16>, vector<8x8xbf16>, vector<8x8xf32> -> vector<8x8xf32>
    %25 = arith.truncf %24 : vector<8x8xf32> to vector<8x8xbf16>
    %c0_10 = arith.constant 0 : index
    %c0_11 = arith.constant 0 : index
    %c0_12 = arith.constant 0 : index
    %26 = vector.load %arg8[%c0_10, %c0_11, %c0_12] : memref<4x8x32xbf16, #tpu.memory_space<vmem>>, vector<1x8x32xbf16>
    %27 = vector.shape_cast %26 : vector<1x8x32xbf16> to vector<8x32xbf16>
    %cst_13 = arith.constant dense<0.000000e+00> : vector<8x32xf32>
    %28 = tpu.matmul %25, %27, %cst_13 {dimension_numbers = #tpu.dot_dimension_numbers<[1], [0], [0], [1], [0, 0, 1, 1], [], []>} : vector<8x8xbf16>, vector<8x32xbf16>, vector<8x32xf32> -> vector<8x32xf32>
    %29 = arith.index_cast %4 : i32 to index
    %c8 = arith.constant 8 : index
    %30 = vector.load %arg19[%29, %c8] : memref<8x96xbf16, #tpu.memory_space<vmem>>, vector<8x8xbf16>
    %c0_14 = arith.constant 0 : index
    %c40 = arith.constant 40 : index
    %31 = vector.load %arg19[%c0_14, %c40] : memref<8x96xbf16, #tpu.memory_space<vmem>>, vector<8x8xbf16>
    %c0_15 = arith.constant 0 : index
    %c72 = arith.constant 72 : index
    %32 = vector.load %arg19[%c0_15, %c72] : memref<8x96xbf16, #tpu.memory_space<vmem>>, vector<8x8xbf16>
    %cst_16 = arith.constant dense<0.000000e+00> : vector<8x8xf32>
    %33 = tpu.matmul %30, %31, %cst_16 {dimension_numbers = #tpu.dot_dimension_numbers<[1], [1], [0], [0], [0, 0, 1, 0], [], []>} : vector<8x8xbf16>, vector<8x8xbf16>, vector<8x8xf32> -> vector<8x8xf32>
    %c0_17 = arith.constant 0 : index
    %c0_18 = arith.constant 0 : index
    %c0_19 = arith.constant 0 : index
    %c0_20 = arith.constant 0 : index
    %34 = vector.load %arg4[%c0_17, %c0_18, %c0_19, %c0_20] : memref<1x1x1x8xf32, #tpu.memory_space<vmem>>, vector<1x1x1x8xf32>
    %35 = vector.shape_cast %34 : vector<1x1x1x8xf32> to vector<1x8xf32>
    %36 = vector.broadcast %35 : vector<1x8xf32> to vector<8x8xf32>
    %37 = arith.addf %33, %36 : vector<8x8xf32>
    %cst_21 = arith.constant dense<0xFF800000> : vector<8xf32>
    %38 = vector.multi_reduction <maximumf>, %37, %cst_21 [1] : vector<8x8xf32> to vector<8xf32>
    %39 = vector.shape_cast %38 : vector<8xf32> to vector<8x1xf32>
    %40 = vector.broadcast %39 : vector<8x1xf32> to vector<8x8xf32>
    %41 = arith.subf %37, %40 : vector<8x8xf32>
    %42 = math.exp %41 : vector<8x8xf32>
    %cst_22 = arith.constant dense<0.000000e+00> : vector<8xf32>
    %43 = vector.multi_reduction <add>, %42, %cst_22 [1] : vector<8x8xf32> to vector<8xf32>
    %44 = vector.shape_cast %43 : vector<8xf32> to vector<8x1xf32>
    %45 = vector.broadcast %44 : vector<8x1xf32> to vector<8x8xf32>
    %46 = arith.divf %42, %45 : vector<8x8xf32>
    %47 = arith.truncf %46 : vector<8x8xf32> to vector<8x8xbf16>
    %cst_23 = arith.constant dense<0.000000e+00> : vector<8x8xf32>
    %48 = tpu.matmul %47, %32, %cst_23 {dimension_numbers = #tpu.dot_dimension_numbers<[1], [0], [0], [1], [0, 0, 1, 1], [], []>} : vector<8x8xbf16>, vector<8x8xbf16>, vector<8x8xf32> -> vector<8x8xf32>
    %49 = arith.truncf %48 : vector<8x8xf32> to vector<8x8xbf16>
    %c1 = arith.constant 1 : index
    %c0_24 = arith.constant 0 : index
    %c0_25 = arith.constant 0 : index
    %50 = vector.load %arg8[%c1, %c0_24, %c0_25] : memref<4x8x32xbf16, #tpu.memory_space<vmem>>, vector<1x8x32xbf16>
    %51 = vector.shape_cast %50 : vector<1x8x32xbf16> to vector<8x32xbf16>
    %cst_26 = arith.constant dense<0.000000e+00> : vector<8x32xf32>
    %52 = tpu.matmul %49, %51, %cst_26 {dimension_numbers = #tpu.dot_dimension_numbers<[1], [0], [0], [1], [0, 0, 1, 1], [], []>} : vector<8x8xbf16>, vector<8x32xbf16>, vector<8x32xf32> -> vector<8x32xf32>
    %53 = arith.addf %28, %52 : vector<8x32xf32>
    %54 = arith.index_cast %4 : i32 to index
    %c16 = arith.constant 16 : index
    %55 = vector.load %arg19[%54, %c16] : memref<8x96xbf16, #tpu.memory_space<vmem>>, vector<8x8xbf16>
    %c0_27 = arith.constant 0 : index
    %c48 = arith.constant 48 : index
    %56 = vector.load %arg19[%c0_27, %c48] : memref<8x96xbf16, #tpu.memory_space<vmem>>, vector<8x8xbf16>
    %c0_28 = arith.constant 0 : index
    %c80 = arith.constant 80 : index
    %57 = vector.load %arg19[%c0_28, %c80] : memref<8x96xbf16, #tpu.memory_space<vmem>>, vector<8x8xbf16>
    %cst_29 = arith.constant dense<0.000000e+00> : vector<8x8xf32>
    %58 = tpu.matmul %55, %56, %cst_29 {dimension_numbers = #tpu.dot_dimension_numbers<[1], [1], [0], [0], [0, 0, 1, 0], [], []>} : vector<8x8xbf16>, vector<8x8xbf16>, vector<8x8xf32> -> vector<8x8xf32>
    %c0_30 = arith.constant 0 : index
    %c0_31 = arith.constant 0 : index
    %c0_32 = arith.constant 0 : index
    %c0_33 = arith.constant 0 : index
    %59 = vector.load %arg4[%c0_30, %c0_31, %c0_32, %c0_33] : memref<1x1x1x8xf32, #tpu.memory_space<vmem>>, vector<1x1x1x8xf32>
    %60 = vector.shape_cast %59 : vector<1x1x1x8xf32> to vector<1x8xf32>
    %61 = vector.broadcast %60 : vector<1x8xf32> to vector<8x8xf32>
    %62 = arith.addf %58, %61 : vector<8x8xf32>
    %cst_34 = arith.constant dense<0xFF800000> : vector<8xf32>
    %63 = vector.multi_reduction <maximumf>, %62, %cst_34 [1] : vector<8x8xf32> to vector<8xf32>
    %64 = vector.shape_cast %63 : vector<8xf32> to vector<8x1xf32>
    %65 = vector.broadcast %64 : vector<8x1xf32> to vector<8x8xf32>
    %66 = arith.subf %62, %65 : vector<8x8xf32>
    %67 = math.exp %66 : vector<8x8xf32>
    %cst_35 = arith.constant dense<0.000000e+00> : vector<8xf32>
    %68 = vector.multi_reduction <add>, %67, %cst_35 [1] : vector<8x8xf32> to vector<8xf32>
    %69 = vector.shape_cast %68 : vector<8xf32> to vector<8x1xf32>
    %70 = vector.broadcast %69 : vector<8x1xf32> to vector<8x8xf32>
    %71 = arith.divf %67, %70 : vector<8x8xf32>
    %72 = arith.truncf %71 : vector<8x8xf32> to vector<8x8xbf16>
    %cst_36 = arith.constant dense<0.000000e+00> : vector<8x8xf32>
    %73 = tpu.matmul %72, %57, %cst_36 {dimension_numbers = #tpu.dot_dimension_numbers<[1], [0], [0], [1], [0, 0, 1, 1], [], []>} : vector<8x8xbf16>, vector<8x8xbf16>, vector<8x8xf32> -> vector<8x8xf32>
    %74 = arith.truncf %73 : vector<8x8xf32> to vector<8x8xbf16>
    %c2 = arith.constant 2 : index
    %c0_37 = arith.constant 0 : index
    %c0_38 = arith.constant 0 : index
    %75 = vector.load %arg8[%c2, %c0_37, %c0_38] : memref<4x8x32xbf16, #tpu.memory_space<vmem>>, vector<1x8x32xbf16>
    %76 = vector.shape_cast %75 : vector<1x8x32xbf16> to vector<8x32xbf16>
    %cst_39 = arith.constant dense<0.000000e+00> : vector<8x32xf32>
    %77 = tpu.matmul %74, %76, %cst_39 {dimension_numbers = #tpu.dot_dimension_numbers<[1], [0], [0], [1], [0, 0, 1, 1], [], []>} : vector<8x8xbf16>, vector<8x32xbf16>, vector<8x32xf32> -> vector<8x32xf32>
    %78 = arith.addf %53, %77 : vector<8x32xf32>
    %79 = arith.index_cast %4 : i32 to index
    %c24 = arith.constant 24 : index
    %80 = vector.load %arg19[%79, %c24] : memref<8x96xbf16, #tpu.memory_space<vmem>>, vector<8x8xbf16>
    %c0_40 = arith.constant 0 : index
    %c56 = arith.constant 56 : index
    %81 = vector.load %arg19[%c0_40, %c56] : memref<8x96xbf16, #tpu.memory_space<vmem>>, vector<8x8xbf16>
    %c0_41 = arith.constant 0 : index
    %c88 = arith.constant 88 : index
    %82 = vector.load %arg19[%c0_41, %c88] : memref<8x96xbf16, #tpu.memory_space<vmem>>, vector<8x8xbf16>
    %cst_42 = arith.constant dense<0.000000e+00> : vector<8x8xf32>
    %83 = tpu.matmul %80, %81, %cst_42 {dimension_numbers = #tpu.dot_dimension_numbers<[1], [1], [0], [0], [0, 0, 1, 0], [], []>} : vector<8x8xbf16>, vector<8x8xbf16>, vector<8x8xf32> -> vector<8x8xf32>
    %c0_43 = arith.constant 0 : index
    %c0_44 = arith.constant 0 : index
    %c0_45 = arith.constant 0 : index
    %c0_46 = arith.constant 0 : index
    %84 = vector.load %arg4[%c0_43, %c0_44, %c0_45, %c0_46] : memref<1x1x1x8xf32, #tpu.memory_space<vmem>>, vector<1x1x1x8xf32>
    %85 = vector.shape_cast %84 : vector<1x1x1x8xf32> to vector<1x8xf32>
    %86 = vector.broadcast %85 : vector<1x8xf32> to vector<8x8xf32>
    %87 = arith.addf %83, %86 : vector<8x8xf32>
    %cst_47 = arith.constant dense<0xFF800000> : vector<8xf32>
    %88 = vector.multi_reduction <maximumf>, %87, %cst_47 [1] : vector<8x8xf32> to vector<8xf32>
    %89 = vector.shape_cast %88 : vector<8xf32> to vector<8x1xf32>
    %90 = vector.broadcast %89 : vector<8x1xf32> to vector<8x8xf32>
    %91 = arith.subf %87, %90 : vector<8x8xf32>
    %92 = math.exp %91 : vector<8x8xf32>
    %cst_48 = arith.constant dense<0.000000e+00> : vector<8xf32>
    %93 = vector.multi_reduction <add>, %92, %cst_48 [1] : vector<8x8xf32> to vector<8xf32>
    %94 = vector.shape_cast %93 : vector<8xf32> to vector<8x1xf32>
    %95 = vector.broadcast %94 : vector<8x1xf32> to vector<8x8xf32>
    %96 = arith.divf %92, %95 : vector<8x8xf32>
    %97 = arith.truncf %96 : vector<8x8xf32> to vector<8x8xbf16>
    %cst_49 = arith.constant dense<0.000000e+00> : vector<8x8xf32>
    %98 = tpu.matmul %97, %82, %cst_49 {dimension_numbers = #tpu.dot_dimension_numbers<[1], [0], [0], [1], [0, 0, 1, 1], [], []>} : vector<8x8xbf16>, vector<8x8xbf16>, vector<8x8xf32> -> vector<8x8xf32>
    %99 = arith.truncf %98 : vector<8x8xf32> to vector<8x8xbf16>
    %c3 = arith.constant 3 : index
    %c0_50 = arith.constant 0 : index
    %c0_51 = arith.constant 0 : index
    %100 = vector.load %arg8[%c3, %c0_50, %c0_51] : memref<4x8x32xbf16, #tpu.memory_space<vmem>>, vector<1x8x32xbf16>
    %101 = vector.shape_cast %100 : vector<1x8x32xbf16> to vector<8x32xbf16>
    %cst_52 = arith.constant dense<0.000000e+00> : vector<8x32xf32>
    %102 = tpu.matmul %99, %101, %cst_52 {dimension_numbers = #tpu.dot_dimension_numbers<[1], [0], [0], [1], [0, 0, 1, 1], [], []>} : vector<8x8xbf16>, vector<8x32xbf16>, vector<8x32xf32> -> vector<8x32xf32>
    %103 = arith.addf %78, %102 : vector<8x32xf32>
    %c0_53 = arith.constant 0 : index
    %c0_54 = arith.constant 0 : index
    %104 = vector.load %arg9[%c0_53, %c0_54] : memref<1x32xf32, #tpu.memory_space<vmem>>, vector<1x32xf32>
    %105 = vector.broadcast %104 : vector<1x32xf32> to vector<8x32xf32>
    %106 = arith.addf %103, %105 : vector<8x32xf32>
    %c0_55 = arith.constant 0 : index
    %c0_56 = arith.constant 0 : index
    %c0_57 = arith.constant 0 : index
    %107 = vector.load %arg3[%c0_55, %c0_56, %c0_57] : memref<1x8x32xf32, #tpu.memory_space<vmem>>, vector<1x8x32xf32>
    %108 = vector.shape_cast %107 : vector<1x8x32xf32> to vector<8x32xf32>
    %109 = arith.addf %108, %106 : vector<8x32xf32>
    %110 = arith.truncf %109 : vector<8x32xf32> to vector<8x32xbf16>
    %c0_58 = arith.constant 0 : index
    %c0_59 = arith.constant 0 : index
    %111 = vector.load %arg10[%c0_58, %c0_59] : memref<32x64xbf16, #tpu.memory_space<vmem>>, vector<32x64xbf16>
    %cst_60 = arith.constant dense<0.000000e+00> : vector<8x64xf32>
    %112 = tpu.matmul %110, %111, %cst_60 {dimension_numbers = #tpu.dot_dimension_numbers<[1], [0], [0], [1], [0, 0, 1, 1], [], []>} : vector<8x32xbf16>, vector<32x64xbf16>, vector<8x64xf32> -> vector<8x64xf32>
    %c0_61 = arith.constant 0 : index
    %c0_62 = arith.constant 0 : index
    %113 = vector.load %arg11[%c0_61, %c0_62] : memref<1x64xf32, #tpu.memory_space<vmem>>, vector<1x64xf32>
    %114 = vector.broadcast %113 : vector<1x64xf32> to vector<8x64xf32>
    %115 = arith.addf %112, %114 : vector<8x64xf32>
    %cst_63 = arith.constant 0.000000e+00 : f32
    %116 = vector.broadcast %cst_63 : f32 to vector<8x64xf32>
    %117 = arith.maximumf %115, %116 : vector<8x64xf32>
    %118 = arith.truncf %117 : vector<8x64xf32> to vector<8x64xbf16>
    %c0_64 = arith.constant 0 : index
    %c0_65 = arith.constant 0 : index
    %119 = vector.load %arg12[%c0_64, %c0_65] : memref<64x32xbf16, #tpu.memory_space<vmem>>, vector<64x32xbf16>
    %cst_66 = arith.constant dense<0.000000e+00> : vector<8x32xf32>
    %120 = tpu.matmul %118, %119, %cst_66 {dimension_numbers = #tpu.dot_dimension_numbers<[1], [0], [0], [1], [0, 0, 1, 1], [], []>} : vector<8x64xbf16>, vector<64x32xbf16>, vector<8x32xf32> -> vector<8x32xf32>
    %121 = arith.addf %109, %120 : vector<8x32xf32>
    %c0_67 = arith.constant 0 : index
    %c0_68 = arith.constant 0 : index
    %122 = vector.load %arg13[%c0_67, %c0_68] : memref<1x32xf32, #tpu.memory_space<vmem>>, vector<1x32xf32>
    %123 = vector.broadcast %122 : vector<1x32xf32> to vector<8x32xf32>
    %124 = arith.addf %121, %123 : vector<8x32xf32>
    %c0_69 = arith.constant 0 : index
    %c0_70 = arith.constant 0 : index
    %c0_71 = arith.constant 0 : index
    %125 = vector.load %arg5[%c0_69, %c0_70, %c0_71] : memref<1x8x1xf32, #tpu.memory_space<vmem>>, vector<1x8x1xf32>
    %126 = vector.shape_cast %125 : vector<1x8x1xf32> to vector<8x1xf32>
    %127 = vector.broadcast %126 : vector<8x1xf32> to vector<8x32xf32>
    %128 = arith.mulf %124, %127 : vector<8x32xf32>
    %c0_72 = arith.constant 0 : index
    %c0_73 = arith.constant 0 : index
    %c0_74 = arith.constant 0 : index
    %129 = vector.load %arg18[%c0_72, %c0_73, %c0_74] : memref<1x8x32xf32, #tpu.memory_space<vmem>>, vector<1x8x32xf32>
    %130 = vector.shape_cast %129 : vector<1x8x32xf32> to vector<8x32xf32>
    %131 = vector.shape_cast %128 : vector<8x32xf32> to vector<1x8x32xf32>
    tpu.vector_store %arg18[%c0_72, %c0_73, %c0_74], %131 {strides = array<i32>} : memref<1x8x32xf32, #tpu.memory_space<vmem>>, vector<1x8x32xf32>,
    return
  }
  func.func @transform_0(%arg0: i32, %arg1: i32) -> (i32, i32, i32) {
    %c0_i32 = arith.constant 0 : i32
    %c0_i32_0 = arith.constant 0 : i32
    %c0_i32_1 = arith.constant 0 : i32
    return %arg0, %c0_i32, %c0_i32_0 : i32, i32, i32
  }
  func.func @transform_1(%arg0: i32, %arg1: i32) -> (i32, i32, i32) {
    %c0_i32 = arith.constant 0 : i32
    %c0_i32_0 = arith.constant 0 : i32
    return %arg0, %arg1, %c0_i32 : i32, i32, i32
  }
  func.func @transform_2(%arg0: i32, %arg1: i32) -> (i32, i32, i32, i32) {
    %c0_i32 = arith.constant 0 : i32
    %c0_i32_0 = arith.constant 0 : i32
    %c0_i32_1 = arith.constant 0 : i32
    %c0_i32_2 = arith.constant 0 : i32
    return %arg0, %c0_i32, %c0_i32_0, %c0_i32_1 : i32, i32, i32, i32
  }
  func.func @transform_3(%arg0: i32, %arg1: i32) -> (i32, i32, i32) {
    %c0_i32 = arith.constant 0 : i32
    %c0_i32_0 = arith.constant 0 : i32
    return %arg0, %arg1, %c0_i32 : i32, i32, i32
  }
  func.func @transform_4(%arg0: i32, %arg1: i32) -> (i32, i32) {
    %c0_i32 = arith.constant 0 : i32
    %c0_i32_0 = arith.constant 0 : i32
    %c0_i32_1 = arith.constant 0 : i32
    return %c0_i32, %c0_i32_0 : i32, i32
  }
  func.func @transform_5(%arg0: i32, %arg1: i32) -> (i32, i32) {
    %c0_i32 = arith.constant 0 : i32
    %c0_i32_0 = arith.constant 0 : i32
    %c0_i32_1 = arith.constant 0 : i32
    return %c0_i32, %c0_i32_0 : i32, i32
  }
  func.func @transform_6(%arg0: i32, %arg1: i32) -> (i32, i32, i32) {
    %c0_i32 = arith.constant 0 : i32
    %c0_i32_0 = arith.constant 0 : i32
    %c0_i32_1 = arith.constant 0 : i32
    %c0_i32_2 = arith.constant 0 : i32
    return %c0_i32, %c0_i32_0, %c0_i32_1 : i32, i32, i32
  }
  func.func @transform_7(%arg0: i32, %arg1: i32) -> (i32, i32) {
    %c0_i32 = arith.constant 0 : i32
    %c0_i32_0 = arith.constant 0 : i32
    %c0_i32_1 = arith.constant 0 : i32
    return %c0_i32, %c0_i32_0 : i32, i32
  }
  func.func @transform_8(%arg0: i32, %arg1: i32) -> (i32, i32) {
    %c0_i32 = arith.constant 0 : i32
    %c0_i32_0 = arith.constant 0 : i32
    %c0_i32_1 = arith.constant 0 : i32
    return %c0_i32, %c0_i32_0 : i32, i32
  }
  func.func @transform_9(%arg0: i32, %arg1: i32) -> (i32, i32) {
    %c0_i32 = arith.constant 0 : i32
    %c0_i32_0 = arith.constant 0 : i32
    %c0_i32_1 = arith.constant 0 : i32
    return %c0_i32, %c0_i32_0 : i32, i32
  }
  func.func @transform_10(%arg0: i32, %arg1: i32) -> (i32, i32) {
    %c0_i32 = arith.constant 0 : i32
    %c0_i32_0 = arith.constant 0 : i32
    %c0_i32_1 = arith.constant 0 : i32
    return %c0_i32, %c0_i32_0 : i32, i32
  }
  func.func @transform_11(%arg0: i32, %arg1: i32) -> (i32, i32) {
    %c0_i32 = arith.constant 0 : i32
    %c0_i32_0 = arith.constant 0 : i32
    %c0_i32_1 = arith.constant 0 : i32
    return %c0_i32, %c0_i32_0 : i32, i32
  }
  func.func @transform_12(%arg0: i32, %arg1: i32) -> (i32, i32) {
    %c0_i32 = arith.constant 0 : i32
    %c0_i32_0 = arith.constant 0 : i32
    %c0_i32_1 = arith.constant 0 : i32
    return %c0_i32, %c0_i32_0 : i32, i32
  }
  func.func @transform_13(%arg0: i32, %arg1: i32) -> (i32, i32) {
    %c0_i32 = arith.constant 0 : i32
    %c0_i32_0 = arith.constant 0 : i32
    %c0_i32_1 = arith.constant 0 : i32
    return %c0_i32, %c0_i32_0 : i32, i32
  }
  func.func @transform_14(%arg0: i32, %arg1: i32) -> (i32, i32) {
    %c0_i32 = arith.constant 0 : i32
    %c0_i32_0 = arith.constant 0 : i32
    %c0_i32_1 = arith.constant 0 : i32
    return %c0_i32, %c0_i32_0 : i32, i32
  }
  func.func @transform_15(%arg0: i32, %arg1: i32) -> (i32, i32) {
    %c0_i32 = arith.constant 0 : i32
    %c0_i32_0 = arith.constant 0 : i32
    %c0_i32_1 = arith.constant 0 : i32
    return %c0_i32, %c0_i32_0 : i32, i32
  }
  func.func @transform_16(%arg0: i32, %arg1: i32) -> (i32, i32, i32) {
    %c0_i32 = arith.constant 0 : i32
    %c0_i32_0 = arith.constant 0 : i32
    return %arg0, %arg1, %c0_i32 : i32, i32, i32
  }
}

</mosaic_0001>

<bundles_post_ra>
// kernel: tpu_custom_call.1
= control target key start
LH: loop header
LB: loop body
LE: loop exit
PB: predicated region body
PF: predicated region fallthrough
CT: control target
= control target key end

     0   :  { %s3857_s0 = inlined_call_operand.hbm [shape: bf16[2,8,32], index: 0, kind: input, shape index: {}]   ;;  %s3858_s1 = inlined_call_operand.hbm [shape: f32[2,8,32], index: 1, kind: input, shape index: {}]   ;;  %s3859_s2 = inlined_call_operand.hbm [shape: f32[2,1,1,8], index: 2, kind: input, shape index: {}]   ;;  %s3860_s3 = inlined_call_operand.hbm [shape: f32[2,8,1], index: 3, kind: input, shape index: {}]   ;;  %s3861_s4 = inlined_call_operand.hbm [shape: bf16[32,96], index: 4, kind: input, shape index: {}]   ;;  %s3862_s5 = inlined_call_operand.hbm [shape: f32[1,96], index: 5, kind: input, shape index: {}]   ;;  %s3863_s6 = inlined_call_operand.hbm [shape: bf16[4,8,32], index: 6, kind: input, shape index: {}]   ;;  %s3864_s7 = inlined_call_operand.hbm [shape: f32[1,32], index: 7, kind: input, shape index: {}]   ;;  %s3865_s8 = inlined_call_operand.hbm [shape: bf16[32,64], index: 8, kind: input, shape index: {}]   ;;  %s3866_s9 = inlined_call_operand.hbm [shape: f32[1,64], index: 9, kind: input, shape index: {}]   ;;  %s3867_s10 = inlined_call_operand.hbm [shape: bf16[64,32], index: 10, kind: input, shape index: {}]   ;;  %s3868_s11 = inlined_call_operand.hbm [shape: f32[1,32], index: 11, kind: input, shape index: {}]   ;;  %s3869_s12 = inlined_call_operand.hbm [shape: f32[1,32], index: 12, kind: input, shape index: {}]   ;;  %s3870_s13 = inlined_call_operand.hbm [shape: f32[1,32], index: 13, kind: input, shape index: {}]   ;;  %s3871_s14 = inlined_call_operand.hbm [shape: f32[1,32], index: 14, kind: input, shape index: {}]   ;;  %s3872_s15 = inlined_call_operand.hbm [shape: f32[1,32], index: 15, kind: input, shape index: {}]   ;;  %s3873_s16 = inlined_call_operand.hbm [shape: f32[2,8,32], index: 16, kind: output, shape index: {}]  }
   0x1   :  { %3908 = sst [smem:[#allocation47_spill]] %s3857_s0 }
   0x2   :  { %3909 = sst [smem:[#allocation48_spill]] %s3858_s1 }
   0x3   :  { %3910 = sst [smem:[#allocation49_spill]] %s3859_s2 }
   0x4   :  { %3911 = sst [smem:[#allocation50_spill]] %s3861_s4 }
   0x5   :  { %3912 = sst [smem:[#allocation51_spill]] %s3862_s5 }
   0x6   :  { %3913 = sst [smem:[#allocation52_spill]] %s3863_s6 }
   0x7   :  { %3914 = sst [smem:[#allocation53_spill]] %s3864_s7 }
   0x8   :  { %3915 = sst [smem:[#allocation54_spill]] %s3865_s8 }
   0x9   :  { %3916 = sst [smem:[#allocation55_spill]] %s3866_s9 }
   0xa   :  { %3917 = sst [smem:[#allocation56_spill]] %s3867_s10 }
   0xb   :  { %3918 = sst [smem:[#allocation57_spill]] %s3868_s11 }
   0xc   :  { %3919 = sst [smem:[#allocation58_spill]] %s3869_s12 }
   0xd   :  { %3920 = sst [smem:[#allocation59_spill]] %s3870_s13 }
   0xe   :  { %3921 = sst [smem:[#allocation60_spill]] %s3871_s14 }
   0xf   :  { %3922 = sst [smem:[#allocation61_spill]] %s3872_s15 }
  0x10   :  { %3923 = sst [smem:[#allocation62_spill]] %s3873_s16 }
  0x11   :  { %21 = vsyncpa [#allocation4], 0 }
  0x12   :  { %23 = vsyncpa [#allocation4 + $0x1], 0 }
  0x13   :  { %24 = vsyncpa [#allocation7], 0 }
  0x14   :  { %26 = vsyncpa [#allocation7 + $0x1], 0 }
  0x15   :  { %27 = vsyncpa [#allocation10], 0 }
  0x16   :  { %29 = vsyncpa [#allocation10 + $0x1], 0 }
  0x17   :  { %30 = vsyncpa [#allocation13], 0 }
  0x18   :  { %31 = vsyncpa [#allocation16], 0 }
  0x19   :  { %32 = vsyncpa [#allocation19], 0 }
  0x1a   :  { %33 = vsyncpa [#allocation22], 0 }
  0x1b   :  { %34 = vsyncpa [#allocation25], 0 }
  0x1c   :  { %35 = vsyncpa [#allocation28], 0 }
  0x1d   :  { %36 = vsyncpa [#allocation5], 0 }
  0x1e   :  { %38 = vsyncpa [#allocation5 + $0x1], 0  ;;  %s3146_s21 = smov 0   ;;  %s3148_s22 = smov 0  }
  0x1f   :  { %s3150_s23 = smov 0   ;;  %s3152_s24 = smov 0  }
  0x20   :  { %s3154_s25 = smov 0   ;;  %s3156_s26 = smov 0  }
  0x21 LB: > { %3924 = sst [smem:[#allocation41_spill]] %s3014_s23  ;;  %s3177_s27 = sadd.s32 4294967295, %s3026_s26   ;;  %s3026_s26 = sphi %s3156_s26, %s44_s26   ;;  %s3022_s25 = sphi %s3154_s25, %s3998_s25   ;;  %s3018_s24 = sphi %s3152_s24, %s3997_s24   ;;  %s3014_s23 = sphi %s3150_s23, %s3993_s23   ;;  %s3010_s22 = sphi %s3148_s22, %s3996_s22   ;;  %s3006_s21 = sphi %s3146_s21, %s3995_s21  }
  0x22   : > { %3925 = sst [smem:[#allocation42_spill]] %s3018_s24  ;;  %p2003_p0 = scmp.ge.s32.totalorder %s3026_s26, 1 }
  0x23   : > { %p3883_p1 = scmp.eq.s32.totalorder %s3177_s27, 0  ;;  %p449_p2 = scmp.lt.s32.totalorder %s3026_s26, 3 }
  0x24   : > { %s3028_s29 = smov [#allocation11]   ;;  %s3029_s17 = smov [#allocation12]  }
  0x25   : > { %p3182_p3 = pnand %p2003_p0, %p449_p2  ;;  %s461_s30 = sshll.u32 %s3028_s29, 4  ;;  %s3186_s30 = int_to_ptr.vmem [resolvable:$true] %s461_s30 }
  0x26   : > { %s475_s18 = sshll.u32 %s3029_s17, 4  ;;  %s3030_s19 = smov [#allocation15]   ;;  %s3197_s18 = int_to_ptr.vmem [resolvable:$true] %s475_s18 }
  0x27   : > { %s3926_s28 = scalar_select %p3182_p3, 1, 0 }
  0x28   : > { %p2268_p4 = pneg %p3182_p3  ;;  %s3199_s20 = sshll.u32 %s3030_s19, 4  ;;  %s500_s20 = int_to_ptr.vmem [resolvable:$true] %s3199_s20 }
  0x29   : > { %3927 = sst [smem:[#allocation43_spill]] %s3926_s28  ;;  %s3929_s4 = sld [smem:[#allocation50_spill]] }
  0x2a   : > { %p3193_p6 = pnand %p2268_p4, %p3883_p1 }
  0x2c   : > { %s3928_s0 = scalar_select %p3193_p6, 1, 0 }
  0x2d   : > { %p3209_p8 = pneg %p3193_p6 }
  0x2f   : > { %s2452_s24 = scalar_lea.hbm %s3929_s4, 256 }
  0x30   : > { %p2453_p7 = scmp.ne.s32.totalorder %s3929_s4, %s2452_s24  ;;  %p2459_p11 = scmp.lt.u32.totalorder %s2452_s24, %s3929_s4 }
  0x31   : > { %s3930_s15 = scalar_select %p3209_p8, 1, 0 }
  0x32   : > { %p2455_p9 = pnand %p3209_p8, %p2453_p7 }
  0x34   : > { %p2456_p10 = pneg %p2455_p9 }
  0x36   : > { %p2461_p12 = pnand %p2459_p11, %p2456_p10 }
  0x38   : > { %2464 = shalt.err (!%p2461_p12)
}
  0x39   : > { %s2465_s2 = scalar_lea.vmem %s3186_s30, 256  ;;  %p2473_p4 = scmp.lt.s32.totalorder %s3186_s30, %s3186_s30 }
  0x3a   : > { %p2466_p13 = scmp.ne.s32.totalorder %s3186_s30, %s2465_s2  ;;  %p2474_p5 = scmp.lt.s32.totalorder %s2465_s2, %s2465_s2 }
  0x3c   : > { %p2468_p0 = pnand %p2466_p13, %p3209_p8  ;;  %p2475_p7 = por %p2474_p5, %p2473_p4 }
  0x3e   : > { %p2469_p2 = pneg %p2468_p0 }
  0x40   : > { %p2476_p9 = pnand %p2475_p7, %p2469_p2 }
  0x42   : > { %2479 = shalt.err (!%p2476_p9)
}
  0x43   : > { %s3885_s16 = smov 64   ;;  %s3887_s24 = smov 4  }
  0x44   : > { %2271 = dma.hbm_to_vmem [thread:$0]  (!%p3193_p6), %s3929_s4, 256, %s3186_s30, [#allocation10], %s3885_s16, %s3885_s16, %s3887_s24  }
  0x45   : > { %s3931_s5 = sld [smem:[#allocation51_spill]] }
  0x4b   : > { %s2480_s2 = scalar_lea.hbm %s3931_s5, 16 }
  0x4c   : > { %p2481_p5 = scmp.ne.s32.totalorder %s3931_s5, %s2480_s2  ;;  %p2487_p12 = scmp.lt.u32.totalorder %s2480_s2, %s3931_s5 }
  0x4e   : > { %p2483_p10 = pnand %p2481_p5, %p3209_p8 }
  0x50   : > { %p2484_p11 = pneg %p2483_p10 }
  0x52   : > { %p2489_p13 = pnand %p2487_p12, %p2484_p11 }
  0x54   : > { %2492 = shalt.err (!%p2489_p13)
}
  0x55   : > { %s2493_s30 = scalar_lea.vmem %s3197_s18, 16  ;;  %s2500_s12 = scalar_lea.vmem %s3197_s18, 32 }
  0x56   : > { %p2494_p0 = scmp.ne.s32.totalorder %s3197_s18, %s2493_s30  ;;  %p2501_p7 = scmp.lt.s32.totalorder %s3197_s18, %s3197_s18 }
  0x57   : > { %p2502_p9 = scmp.lt.s32.totalorder %s2500_s12, %s2493_s30 }
  0x58   : > { %p2496_p2 = pnand %p2494_p0, %p3209_p8 }
  0x59   : > { %p2503_p5 = por %p2502_p9, %p2501_p7 }
  0x5a   : > { %p2497_p4 = pneg %p2496_p2 }
  0x5c   : > { %p2504_p10 = pnand %p2503_p5, %p2497_p4 }
  0x5e   : > { %2507 = shalt.err (!%p2504_p10)
}
  0x5f   : > { %2274 = dma.hbm_to_vmem [thread:$0]  (!%p3193_p6), %s3931_s5, 16, %s3197_s18, [#allocation13]  }
  0x60   : > { %s3932_s7 = sld [smem:[#allocation53_spill]] }
  0x66   : > { %s2508_s29 = scalar_lea.hbm %s3932_s7, 16 }
  0x67   : > { %p2509_p11 = scmp.ne.s32.totalorder %s3932_s7, %s2508_s29  ;;  %p2515_p0 = scmp.lt.u32.totalorder %s2508_s29, %s3932_s7 }
  0x69   : > { %p2511_p12 = pnand %p2509_p11, %p3209_p8 }
  0x6b   : > { %p2512_p13 = pneg %p2511_p12 }
  0x6d   : > { %p2517_p2 = pnand %p2515_p0, %p2512_p13 }
  0x6f   : > { %2520 = shalt.err (!%p2517_p2)
}
  0x70   : > { %s2521_s12 = scalar_lea.vmem %s500_s20, 16  ;;  %s2528_s18 = scalar_lea.vmem %s500_s20, 32 }
  0x71   : > { %p2522_p4 = scmp.ne.s32.totalorder %s500_s20, %s2521_s12  ;;  %p2529_p5 = scmp.lt.s32.totalorder %s500_s20, %s500_s20 }
  0x72   : > { %p2530_p10 = scmp.lt.s32.totalorder %s2528_s18, %s2521_s12 }
  0x73   : > { %p2524_p7 = pnand %p2522_p4, %p3209_p8 }
  0x74   : > { %p2531_p1 = por %p2530_p10, %p2529_p5 }
  0x75   : > { %p2525_p9 = pneg %p2524_p7 }
  0x77   : > { %p2532_p3 = pnand %p2531_p1, %p2525_p9 }
  0x79   : > { %2535 = shalt.err (!%p2532_p3)
}
  0x7a   : > { %2280 = dma.hbm_to_vmem [thread:$0]  (!%p3193_p6), %s3932_s7, 16, %s500_s20, [#allocation16]  }
  0x7b   : > { %s3033_s14 = smov [#allocation18]   ;;  %s3034_s29 = smov [#allocation21]  }
  0x7c   : > { %s523_s28 = sshll.u32 %s3033_s14, 4  ;;  %s547_s17 = sshll.u32 %s3034_s29, 4  ;;  %s524_s28 = int_to_ptr.vmem [resolvable:$true] %s523_s28  ;;  %s548_s17 = int_to_ptr.vmem [resolvable:$true] %s547_s17 }
  0x7d   : > { %s3933_s9 = sld [smem:[#allocation55_spill]] }
  0x83   : > { %s2536_s30 = scalar_lea.hbm %s3933_s9, 16 }
  0x84   : > { %p2537_p1 = scmp.ne.s32.totalorder %s3933_s9, %s2536_s30  ;;  %p2543_p12 = scmp.lt.u32.totalorder %s2536_s30, %s3933_s9 }
  0x86   : > { %p2539_p3 = pnand %p2537_p1, %p3209_p8 }
  0x88   : > { %p2540_p11 = pneg %p2539_p3 }
  0x8a   : > { %p2545_p13 = pnand %p2543_p12, %p2540_p11 }
  0x8c   : > { %2548 = shalt.err (!%p2545_p13)
}
  0x8d   : > { %s2549_s20 = scalar_lea.vmem %s524_s28, 16  ;;  %s2556_s10 = scalar_lea.vmem %s524_s28, 32 }
  0x8e   : > { %p2550_p0 = scmp.ne.s32.totalorder %s524_s28, %s2549_s20  ;;  %p2557_p7 = scmp.lt.s32.totalorder %s524_s28, %s524_s28 }
  0x8f   : > { %p2558_p9 = scmp.lt.s32.totalorder %s2556_s10, %s2549_s20 }
  0x90   : > { %p2552_p2 = pnand %p2550_p0, %p3209_p8 }
  0x91   : > { %p2559_p5 = por %p2558_p9, %p2557_p7 }
  0x92   : > { %p2553_p4 = pneg %p2552_p2 }
  0x94   : > { %p2560_p10 = pnand %p2559_p5, %p2553_p4 }
  0x96   : > { %2563 = shalt.err (!%p2560_p10)
}
  0x97   : > { %2286 = dma.hbm_to_vmem [thread:$0]  (!%p3193_p6), %s3933_s9, 16, %s524_s28, [#allocation19]  }
  0x98   : > { %s3934_s11 = sld [smem:[#allocation57_spill]] }
  0x9e   : > { %s2564_s2 = scalar_lea.hbm %s3934_s11, 16 }
  0x9f   : > { %p2565_p1 = scmp.ne.s32.totalorder %s3934_s11, %s2564_s2  ;;  %p2571_p12 = scmp.lt.u32.totalorder %s2564_s2, %s3934_s11 }
  0xa1   : > { %p2567_p3 = pnand %p2565_p1, %p3209_p8 }
  0xa3   : > { %p2568_p11 = pneg %p2567_p3 }
  0xa5   : > { %p2573_p13 = pnand %p2571_p12, %p2568_p11 }
  0xa7   : > { %2576 = shalt.err (!%p2573_p13)
}
  0xa8   : > { %s2577_s20 = scalar_lea.vmem %s548_s17, 16  ;;  %s2584_s28 = scalar_lea.vmem %s548_s17, 32 }
  0xa9   : > { %p2578_p0 = scmp.ne.s32.totalorder %s548_s17, %s2577_s20  ;;  %p2585_p7 = scmp.lt.s32.totalorder %s548_s17, %s548_s17 }
  0xaa   : > { %p2586_p9 = scmp.lt.s32.totalorder %s2584_s28, %s2577_s20 }
  0xab   : > { %p2580_p2 = pnand %p2578_p0, %p3209_p8 }
  0xac   : > { %p2587_p5 = por %p2586_p9, %p2585_p7 }
  0xad   : > { %p2581_p4 = pneg %p2580_p2 }
  0xaf   : > { %p2588_p10 = pnand %p2587_p5, %p2581_p4 }
  0xb1   : > { %2591 = shalt.err (!%p2588_p10)
}
  0xb2   : > { %2292 = dma.hbm_to_vmem [thread:$0]  (!%p3193_p6), %s3934_s11, 16, %s548_s17, [#allocation22]  }
  0xb3   : > { %s3035_s29 = smov [#allocation24]   ;;  %s3935_s13 = sld [smem:[#allocation59_spill]] }
  0xb4   : > { %s569_s16 = sshll.u32 %s3035_s29, 4  ;;  %s570_s16 = int_to_ptr.vmem [resolvable:$true] %s569_s16 }
  0xb9   : > { %s2592_s30 = scalar_lea.hbm %s3935_s13, 16 }
  0xba   : > { %p2593_p1 = scmp.ne.s32.totalorder %s3935_s13, %s2592_s30  ;;  %p2599_p12 = scmp.lt.u32.totalorder %s2592_s30, %s3935_s13 }
  0xbc   : > { %p2595_p3 = pnand %p2593_p1, %p3209_p8 }
  0xbe   : > { %p2596_p11 = pneg %p2595_p3 }
  0xc0   : > { %p2601_p13 = pnand %p2599_p12, %p2596_p11 }
  0xc2   : > { %2604 = shalt.err (!%p2601_p13)
}
  0xc3   : > { %s2605_s17 = scalar_lea.vmem %s570_s16, 16  ;;  %s2612_s28 = scalar_lea.vmem %s570_s16, 32 }
  0xc4   : > { %p2606_p0 = scmp.ne.s32.totalorder %s570_s16, %s2605_s17  ;;  %p2613_p7 = scmp.lt.s32.totalorder %s570_s16, %s570_s16 }
  0xc5   : > { %p2614_p9 = scmp.lt.s32.totalorder %s2612_s28, %s2605_s17 }
  0xc6   : > { %p2608_p2 = pnand %p2606_p0, %p3209_p8 }
  0xc7   : > { %p2615_p5 = por %p2614_p9, %p2613_p7 }
  0xc8   : > { %p2609_p4 = pneg %p2608_p2 }
  0xca   : > { %p2616_p10 = pnand %p2615_p5, %p2609_p4 }
  0xcc   : > { %2619 = shalt.err (!%p2616_p10)
}
  0xcd   : > { %2298 = dma.hbm_to_vmem [thread:$0]  (!%p3193_p6), %s3935_s13, 16, %s570_s16, [#allocation25]  }
  0xce   : > { %s2002_s29 = sadd.s32 4294967294, %s3026_s26   ;;  %s56_s19 = sadd.s32 1, %s3022_s25 }
  0xcf   : > { %p58_p1 = scmp.ge.s32.totalorder %s56_s19, 2  ;;  %s63_s2 = sadd.s32 1, %s3014_s23 }
  0xd0   : > { %p70_p3 = scmp.ne.s32.totalorder %s3014_s23, %s3010_s22  ;;  %p71_p11 = scmp.eq.s32.totalorder %s3026_s26, 0 }
  0xd1   : > { %s4000_s19 = smov (%p58_p1, %s56_s19), 0  ;;  %p76_p13 = scmp.ne.s32.totalorder %s3010_s22, %s3006_s21 }
  0xd2   : > { %3936 = sst [smem:[#allocation44_spill]] %s4000_s19  ;;  %p3338_p12 = por %p71_p11, %p70_p3 }
  0xd3   : > { %s60_s16 = ssub.s32 %s3022_s25, %s4000_s19  ;;  %p436_p0 = scmp.eq.s32.totalorder %s3177_s27, 1 }
  0xd4   : > { %p61_p2 = scmp.eq.s32.totalorder %s60_s16, 0  ;;  %p3938_p4 = scmp.eq.s32.totalorder %s3177_s27, 0 }
  0xd5   : > { %p3353_p9 = por %p436_p0, %p70_p3  ;;  %p442_p5 = scmp.eq.s32.totalorder %s2002_s29, 1 }
  0xd6   : > { %p3349_p7 = por %p3938_p4, %p76_p13  ;;  %p2334_p1 = scmp.lt.s32.totalorder %s3026_s26, 2 }
  0xd7   : > { %s3940_s18 = scalar_select %p3353_p9, 1, 0 }
  0xd8   : > { %s3939_s12 = scalar_select %p3349_p7, 1, 0 }
  0xd9   : > { %s3358_s8 = scalar_select %p61_p2, %s3014_s23, %s63_s2  }
  0xda   : > { %p3360_p10 = por %p442_p5, %p76_p13  ;;  %s3366_s17 = sand.u32 1, %s3014_s23  }
  0xdb   : > { %3941 = sst [smem:[#allocation45_spill]] %s3358_s8  ;;  %p3371_p11 = pnand %p2334_p1, %p3338_p12 }
  0xdc   : > { %s3942_s20 = scalar_select %p3360_p10, 1, 0 }
  0xdd   : > { %s3944_s10 = scalar_select %p3371_p11, 1, 0 }
  0xde   : > { %3943 = sst [smem:[#allocation46_spill]] %s3942_s20  ;;  %s3889_s14 = sshll.u32 %s3366_s17, 3 }
  0xdf   : > { %s3890_s29 = sshll.u32 %s3022_s25, 7  ;;  %s3945_s1 = sld [smem:[#allocation48_spill]] }
  0xe0   : > { %s624_s28 = scalar_lea.vmem [#allocation6], %s3889_s14  ;;  %s3946_s4 = sand.u32 1, %s3026_s26  }
  0xe1   : > { %s632_s30 = sshll.u32 %s624_s28, 4  ;;  %s3390_s5 = scalar_lea.sflag [#allocation7], %s3946_s4  ;;  %s3386_s30 = int_to_ptr.vmem [resolvable:$true] %s632_s30 }
  0xe2   : > { %p3396_p12 = pneg %p3371_p11 }
  0xe4   : > { %s3947_s9 = scalar_select %p3396_p12, 1, 0 }
  0xe5   : > { %s3382_s24 = scalar_lea.hbm %s3945_s1, %s3890_s29  ;;  %s2625_s28 = scalar_lea.hbm %s3945_s1, 256 }
  0xe6   : > { %s2620_s7 = scalar_lea.hbm %s3382_s24, 128  ;;  %p2626_p2 = scmp.lt.u32.totalorder %s3382_s24, %s3945_s1 }
  0xe7   : > { %p2621_p3 = scmp.ne.s32.totalorder %s3382_s24, %s2620_s7  ;;  %p2627_p4 = scmp.lt.u32.totalorder %s2625_s28, %s2620_s7 }
  0xe8   : > { %p2629_p1 = scmp.lt.u32.totalorder %s2620_s7, %s3382_s24 }
  0xe9   : > { %p2623_p13 = pnand %p3396_p12, %p2621_p3  ;;  %p2628_p5 = por %p2627_p4, %p2626_p2 }
  0xeb   : > { %p2624_p0 = pneg %p2623_p13  ;;  %p2630_p10 = por %p2629_p1, %p2628_p5 }
  0xed   : > { %p2631_p9 = pnand %p2630_p10, %p2624_p0 }
  0xef   : > { %2634 = shalt.err (!%p2631_p9)
}
  0xf0   : > { %s2635_s4 = scalar_lea.vmem %s3386_s30, 128  ;;  %s3036_s2 = smov [#allocation6]  }
  0xf1   : > { %p2636_p3 = scmp.ne.s32.totalorder %s3386_s30, %s2635_s4  ;;  %s2640_s16 = sshll.u32 %s3036_s2, 4  ;;  %s2641_s16 = int_to_ptr.vmem [resolvable:$false] %s2640_s16 }
  0xf2   : > { %s2642_s14 = scalar_lea.vmem %s2641_s16, 256  ;;  %p2643_p6 = scmp.lt.s32.totalorder %s3386_s30, %s2641_s16 }
  0xf3   : > { %p2638_p13 = pnand %p2636_p3, %p3396_p12  ;;  %p2644_p8 = scmp.lt.s32.totalorder %s2642_s14, %s2635_s4 }
  0xf5   : > { %p2639_p7 = pneg %p2638_p13  ;;  %p2645_p2 = por %p2644_p8, %p2643_p6 }
  0xf7   : > { %p2646_p4 = pnand %p2645_p2, %p2639_p7 }
  0xf9   : > { %2649 = shalt.err (!%p2646_p4)
}
  0xfa   : > { %2311 = dma.hbm_to_vmem [thread:$0]  (!%p3371_p11), %s3382_s24, 128, %s3386_s30, %s3390_s5  }
  0xfb   : > { %s3948_s7 = sshll.u32 %s3022_s25, 7  ;;  %s3037_s1 = smov [#allocation14]  }
  0xfc   : > { %s3425_s2 = scalar_lea.hbm %s3860_s3, %s3948_s7  ;;  %s485_s16 = sshll.u32 %s3037_s1, 4  ;;  %s486_s16 = int_to_ptr.vmem [resolvable:$true] %s485_s16 }
  0xfd   : > { %s3038_s4 = smov [#allocation17]   ;;  %s3949_s6 = sld [smem:[#allocation52_spill]] }
  0xfe   : > { %s509_s14 = sshll.u32 %s3038_s4, 4  ;;  %p3950_p8 = scmp.ne.s32.totalorder %s3930_s15, 0  ;;  %s3427_s14 = int_to_ptr.vmem [resolvable:$true] %s509_s14 }
 0x103   : > { %s2650_s19 = scalar_lea.hbm %s3949_s6, 256 }
 0x104   : > { %p2651_p6 = scmp.ne.s32.totalorder %s3949_s6, %s2650_s19  ;;  %p2657_p10 = scmp.lt.u32.totalorder %s2650_s19, %s3949_s6 }
 0x106   : > { %p2653_p7 = pnand %p2651_p6, %p3950_p8 }
 0x108   : > { %p2654_p9 = pneg %p2653_p7 }
 0x10a   : > { %p2659_p0 = pnand %p2657_p10, %p2654_p9 }
 0x10c   : > { %2662 = shalt.err (!%p2659_p0)
}
 0x10d   : > { %s2663_s1 = scalar_lea.vmem %s486_s16, 256  ;;  %p2671_p13 = scmp.lt.s32.totalorder %s486_s16, %s486_s16 }
 0x10e   : > { %p2664_p5 = scmp.ne.s32.totalorder %s486_s16, %s2663_s1  ;;  %p2672_p2 = scmp.lt.s32.totalorder %s2663_s1, %s2663_s1 }
 0x110   : > { %p2666_p1 = pnand %p2664_p5, %p3950_p8  ;;  %p2673_p4 = por %p2672_p2, %p2671_p13 }
 0x112   : > { %p2667_p3 = pneg %p2666_p1 }
 0x114   : > { %p2674_p11 = pnand %p2673_p4, %p2667_p3 }
 0x116   : > { %2677 = shalt.err (!%p2674_p11)
}
 0x117   : > { %p3951_p6 = scmp.ne.s32.totalorder %s3928_s0, 0  ;;  %s3952_s11 = smov 4  }
 0x118   : > { %s3953_s13 = smov 64   ;;  %s3954_s29 = sld [smem:[#allocation54_spill]] }
 0x119   : > { %2277 = dma.hbm_to_vmem [thread:$0]  (!%p3951_p6), %s3949_s6, 256, %s486_s16, [#allocation13], %s3953_s13, %s3953_s13, %s3952_s11  }
 0x11e   : > { %s2678_s28 = scalar_lea.hbm %s3954_s29, 256 }
 0x11f   : > { %p2679_p7 = scmp.ne.s32.totalorder %s3954_s29, %s2678_s28  ;;  %p2685_p10 = scmp.lt.u32.totalorder %s2678_s28, %s3954_s29 }
 0x121   : > { %p2681_p11 = pnand %p2679_p7, %p3950_p8 }
 0x123   : > { %p2682_p9 = pneg %p2681_p11 }
 0x125   : > { %p2687_p0 = pnand %p2685_p10, %p2682_p9 }
 0x127   : > { %2690 = shalt.err (!%p2687_p0)
}
 0x128   : > { %s2691_s16 = scalar_lea.vmem %s3427_s14, 256  ;;  %p2699_p13 = scmp.lt.s32.totalorder %s3427_s14, %s3427_s14 }
 0x129   : > { %p2692_p5 = scmp.ne.s32.totalorder %s3427_s14, %s2691_s16  ;;  %p2700_p2 = scmp.lt.s32.totalorder %s2691_s16, %s2691_s16 }
 0x12b   : > { %p2694_p1 = pnand %p2692_p5, %p3950_p8  ;;  %p2701_p4 = por %p2700_p2, %p2699_p13 }
 0x12d   : > { %p2695_p3 = pneg %p2694_p1 }
 0x12f   : > { %p2702_p7 = pnand %p2701_p4, %p2695_p3 }
 0x131   : > { %2705 = shalt.err (!%p2702_p7)
}
 0x132   : > { %2283 = dma.hbm_to_vmem [thread:$0]  (!%p3951_p6), %s3954_s29, 256, %s3427_s14, [#allocation16], %s3953_s13, %s3953_s13, %s3952_s11  }
 0x133   : > { %s3039_s8 = smov [#allocation20]   ;;  %s3040_s28 = smov [#allocation23]  }
 0x134   : > { %s533_s7 = sshll.u32 %s3039_s8, 4  ;;  %s558_s4 = sshll.u32 %s3040_s28, 4  ;;  %s534_s7 = int_to_ptr.vmem [resolvable:$true] %s533_s7  ;;  %s3476_s4 = int_to_ptr.vmem [resolvable:$true] %s558_s4 }
 0x135   : > { %s3955_s1 = sld [smem:[#allocation56_spill]] }
 0x13b   : > { %s2706_s16 = scalar_lea.hbm %s3955_s1, 512 }
 0x13c   : > { %p2707_p11 = scmp.ne.s32.totalorder %s3955_s1, %s2706_s16  ;;  %p2713_p0 = scmp.lt.u32.totalorder %s2706_s16, %s3955_s1 }
 0x13e   : > { %p2709_p9 = pnand %p2707_p11, %p3950_p8 }
 0x140   : > { %p2710_p10 = pneg %p2709_p9 }
 0x142   : > { %p2715_p5 = pnand %p2713_p0, %p2710_p10 }
 0x144   : > { %2718 = shalt.err (!%p2715_p5)
}
 0x145   : > { %s2719_s19 = scalar_lea.vmem %s534_s7, 512  ;;  %p2727_p2 = scmp.lt.s32.totalorder %s534_s7, %s534_s7 }
 0x146   : > { %p2720_p1 = scmp.ne.s32.totalorder %s534_s7, %s2719_s19  ;;  %p2728_p4 = scmp.lt.s32.totalorder %s2719_s19, %s2719_s19 }
 0x148   : > { %p2722_p3 = pnand %p2720_p1, %p3950_p8  ;;  %p2729_p7 = por %p2728_p4, %p2727_p2 }
 0x14a   : > { %p2723_p13 = pneg %p2722_p3 }
 0x14c   : > { %p2730_p12 = pnand %p2729_p7, %p2723_p13 }
 0x14e   : > { %2733 = shalt.err (!%p2730_p12)
}
 0x14f   : > { %2289 = dma.hbm_to_vmem [thread:$0]  (!%p3951_p6), %s3955_s1, 512, %s534_s7, [#allocation19], %s3953_s13, %s3953_s13, %s3952_s11  }
 0x150   : > { %s3956_s24 = sld [smem:[#allocation58_spill]] }
 0x156   : > { %s3957_s30 = smov %s3956_s24  ;;  %s2734_s16 = scalar_lea.hbm %s3956_s24, 16 }
 0x157   : > { %p2735_p11 = scmp.ne.s32.totalorder %s3957_s30, %s2734_s16  ;;  %p2741_p10 = scmp.lt.u32.totalorder %s2734_s16, %s3957_s30 }
 0x159   : > { %p2737_p12 = pnand %p2735_p11, %p3950_p8 }
 0x15b   : > { %p2738_p9 = pneg %p2737_p12 }
 0x15d   : > { %p2743_p0 = pnand %p2741_p10, %p2738_p9 }
 0x15f   : > { %2746 = shalt.err (!%p2743_p0)
}
 0x160   : > { %s2747_s11 = scalar_lea.vmem %s3476_s4, 16  ;;  %s2754_s13 = scalar_lea.vmem %s3476_s4, 32 }
 0x161   : > { %p2748_p5 = scmp.ne.s32.totalorder %s3476_s4, %s2747_s11  ;;  %p2755_p13 = scmp.lt.s32.totalorder %s3476_s4, %s3476_s4 }
 0x162   : > { %p2756_p2 = scmp.lt.s32.totalorder %s2754_s13, %s2747_s11 }
 0x163   : > { %p2750_p1 = pnand %p2748_p5, %p3950_p8 }
 0x164   : > { %p2757_p4 = por %p2756_p2, %p2755_p13 }
 0x165   : > { %p2751_p3 = pneg %p2750_p1 }
 0x167   : > { %p2758_p7 = pnand %p2757_p4, %p2751_p3 }
 0x169   : > { %2761 = shalt.err (!%p2758_p7)
}
 0x16a   : > { %2295 = dma.hbm_to_vmem [thread:$0]  (!%p3951_p6), %s3957_s30, 16, %s3476_s4, [#allocation22]  }
 0x16b   : > { %s3041_s6 = smov [#allocation26]   ;;  %s3042_s8 = smov [#allocation27]  }
 0x16c   : > { %s580_s20 = sshll.u32 %s3041_s6, 4  ;;  %s591_s28 = sshll.u32 %s3042_s8, 4  ;;  %s581_s20 = int_to_ptr.vmem [resolvable:$true] %s580_s20  ;;  %s3523_s28 = int_to_ptr.vmem [resolvable:$true] %s591_s28 }
 0x16d   : > { %s3958_s23 = sld [smem:[#allocation60_spill]] }
 0x173   : > { %s3959_s14 = smov %s3958_s23  ;;  %s2762_s19 = scalar_lea.hbm %s3958_s23, 16 }
 0x174   : > { %p2763_p11 = scmp.ne.s32.totalorder %s3959_s14, %s2762_s19  ;;  %p2769_p10 = scmp.lt.u32.totalorder %s2762_s19, %s3959_s14 }
 0x176   : > { %p2765_p12 = pnand %p2763_p11, %p3950_p8 }
 0x178   : > { %p2766_p9 = pneg %p2765_p12 }
 0x17a   : > { %p2771_p0 = pnand %p2769_p10, %p2766_p9 }
 0x17c   : > { %2774 = shalt.err (!%p2771_p0)
}
 0x17d   : > { %s2775_s7 = scalar_lea.vmem %s581_s20, 16  ;;  %s2782_s6 = scalar_lea.vmem %s581_s20, 32 }
 0x17e   : > { %p2776_p5 = scmp.ne.s32.totalorder %s581_s20, %s2775_s7  ;;  %p2783_p13 = scmp.lt.s32.totalorder %s581_s20, %s581_s20 }
 0x17f   : > { %p2784_p2 = scmp.lt.s32.totalorder %s2782_s6, %s2775_s7 }
 0x180   : > { %p2778_p1 = pnand %p2776_p5, %p3950_p8 }
 0x181   : > { %p2785_p4 = por %p2784_p2, %p2783_p13 }
 0x182   : > { %p2779_p3 = pneg %p2778_p1 }
 0x184   : > { %p2786_p7 = pnand %p2785_p4, %p2779_p3 }
 0x186   : > { %2789 = shalt.err (!%p2786_p7)
}
 0x187   : > { %2301 = dma.hbm_to_vmem [thread:$0]  (!%p3951_p6), %s3959_s14, 16, %s581_s20, [#allocation25]  }
 0x188   : > { %s3960_s19 = sld [smem:[#allocation61_spill]] }
 0x18e   : > { %s2790_s11 = scalar_lea.hbm %s3960_s19, 16 }
 0x18f   : > { %p2791_p11 = scmp.ne.s32.totalorder %s3960_s19, %s2790_s11  ;;  %p2797_p10 = scmp.lt.u32.totalorder %s2790_s11, %s3960_s19 }
 0x191   : > { %p2793_p12 = pnand %p2791_p11, %p3950_p8 }
 0x193   : > { %p2794_p9 = pneg %p2793_p12 }
 0x195   : > { %p2799_p0 = pnand %p2797_p10, %p2794_p9 }
 0x197   : > { %2802 = shalt.err (!%p2799_p0)
}
 0x198   : > { %s2803_s20 = scalar_lea.vmem %s3523_s28, 16  ;;  %s2810_s6 = scalar_lea.vmem %s3523_s28, 32 }
 0x199   : > { %p2804_p5 = scmp.ne.s32.totalorder %s3523_s28, %s2803_s20  ;;  %p2811_p13 = scmp.lt.s32.totalorder %s3523_s28, %s3523_s28 }
 0x19a   : > { %p2812_p2 = scmp.lt.s32.totalorder %s2810_s6, %s2803_s20 }
 0x19b   : > { %p2806_p1 = pnand %p2804_p5, %p3950_p8 }
 0x19c   : > { %p2813_p4 = por %p2812_p2, %p2811_p13 }
 0x19d   : > { %p2807_p3 = pneg %p2806_p1 }
 0x19f   : > { %p2814_p7 = pnand %p2813_p4, %p2807_p3 }
 0x1a1   : > { %2817 = shalt.err (!%p2814_p7)
}
 0x1a2   : > { %2304 = dma.hbm_to_vmem [thread:$0]  (!%p3951_p6), %s3960_s19, 16, %s3523_s28, [#allocation28]  }
 0x1a3   : > { %s2017_s15 = sshll.u32 %s3366_s17, 2  ;;  %s2018_s16 = sshll.u32 %s3022_s25, 6 }
 0x1a4   : > { %s3961_s13 = sld [smem:[#allocation47_spill]]  ;;  %s606_s0 = scalar_lea.vmem [#allocation3], %s2017_s15 }
 0x1a5   : > { %s613_s4 = sshll.u32 %s606_s0, 4  ;;  %s603_s7 = scalar_lea.sflag [#allocation4], %s3366_s17  ;;  %s614_s4 = int_to_ptr.vmem [resolvable:$true] %s613_s4 }
 0x1a6   : > { %p3962_p11 = scmp.ne.s32.totalorder %s3947_s9, 0 }
 0x1aa   : > { %s3572_s29 = scalar_lea.hbm %s3961_s13, %s2018_s16  ;;  %s2823_s8 = scalar_lea.hbm %s3961_s13, 128 }
 0x1ab   : > { %s2818_s20 = scalar_lea.hbm %s3572_s29, 64  ;;  %p2824_p9 = scmp.lt.u32.totalorder %s3572_s29, %s3961_s13 }
 0x1ac   : > { %p2819_p8 = scmp.ne.s32.totalorder %s3572_s29, %s2818_s20  ;;  %p2825_p10 = scmp.lt.u32.totalorder %s2823_s8, %s2818_s20 }
 0x1ad   : > { %p2827_p5 = scmp.lt.u32.totalorder %s2818_s20, %s3572_s29 }
 0x1ae   : > { %p2821_p12 = pnand %p2819_p8, %p3962_p11  ;;  %p2826_p0 = por %p2825_p10, %p2824_p9 }
 0x1b0   : > { %p2822_p6 = pneg %p2821_p12  ;;  %p2828_p1 = por %p2827_p5, %p2826_p0 }
 0x1b2   : > { %p2829_p3 = pnand %p2828_p1, %p2822_p6 }
 0x1b4   : > { %2832 = shalt.err (!%p2829_p3)
}
 0x1b5   : > { %s2833_s15 = scalar_lea.vmem %s614_s4, 64  ;;  %s3043_s23 = smov [#allocation3]  }
 0x1b6   : > { %p2834_p13 = scmp.ne.s32.totalorder %s614_s4, %s2833_s15  ;;  %s2838_s11 = sshll.u32 %s3043_s23, 4  ;;  %s2839_s11 = int_to_ptr.vmem [resolvable:$false] %s2838_s11 }
 0x1b7   : > { %s2840_s0 = scalar_lea.vmem %s2839_s11, 128  ;;  %p2841_p7 = scmp.lt.s32.totalorder %s614_s4, %s2839_s11 }
 0x1b8   : > { %p2836_p2 = pnand %p2834_p13, %p3962_p11  ;;  %p2842_p8 = scmp.lt.s32.totalorder %s2840_s0, %s2833_s15 }
 0x1ba   : > { %p2837_p4 = pneg %p2836_p2  ;;  %p2843_p12 = por %p2842_p8, %p2841_p7 }
 0x1bc   : > { %p2844_p9 = pnand %p2843_p12, %p2837_p4 }
 0x1be   : > { %2847 = shalt.err (!%p2844_p9)
}
 0x1bf   : > { %p3963_p10 = scmp.ne.s32.totalorder %s3944_s10, 0  ;;  %s2021_s20 = sshll.u32 %s3022_s25, 4 }
 0x1c0   : > { %s642_s28 = scalar_lea.vmem [#allocation8], %s3366_s17  ;;  %s3964_s16 = sld [smem:[#allocation49_spill]] }
 0x1c1   : > { %2308 = dma.hbm_to_vmem [thread:$0]  (!%p3963_p10), %s3572_s29, 64, %s614_s4, %s603_s7  }
 0x1c2   : > { %s649_s6 = sshll.u32 %s642_s28, 4  ;;  %s650_s6 = int_to_ptr.vmem [resolvable:$true] %s649_s6 }
 0x1c6   : > { %s647_s23 = scalar_lea.hbm %s3964_s16, %s2021_s20  ;;  %s2853_s1 = scalar_lea.hbm %s3964_s16, 32 }
 0x1c7   : > { %s2848_s11 = scalar_lea.hbm %s647_s23, 16  ;;  %p2854_p1 = scmp.lt.u32.totalorder %s647_s23, %s3964_s16 }
 0x1c8   : > { %p2849_p6 = scmp.ne.s32.totalorder %s647_s23, %s2848_s11  ;;  %p2855_p3 = scmp.lt.u32.totalorder %s2853_s1, %s2848_s11 }
 0x1c9   : > { %p2857_p2 = scmp.lt.u32.totalorder %s2848_s11, %s647_s23 }
 0x1ca   : > { %p2851_p0 = pnand %p2849_p6, %p3962_p11  ;;  %p2856_p13 = por %p2855_p3, %p2854_p1 }
 0x1cc   : > { %p2852_p5 = pneg %p2851_p0  ;;  %p2858_p4 = por %p2857_p2, %p2856_p13 }
 0x1ce   : > { %p2859_p7 = pnand %p2858_p4, %p2852_p5 }
 0x1d0   : > { %2862 = shalt.err (!%p2859_p7)
}
 0x1d1   : > { %s2863_s29 = scalar_lea.vmem %s650_s6, 16  ;;  %s3044_s4 = smov [#allocation8]  }
 0x1d2   : > { %p2864_p8 = scmp.ne.s32.totalorder %s650_s6, %s2863_s29  ;;  %s2868_s7 = sshll.u32 %s3044_s4, 4  ;;  %s2869_s7 = int_to_ptr.vmem [resolvable:$false] %s2868_s7 }
 0x1d3   : > { %s2870_s20 = scalar_lea.vmem %s2869_s7, 32  ;;  %p2871_p6 = scmp.lt.s32.totalorder %s650_s6, %s2869_s7 }
 0x1d4   : > { %p2866_p12 = pnand %p2864_p8, %p3962_p11  ;;  %p2872_p0 = scmp.lt.s32.totalorder %s2870_s20, %s2863_s29 }
 0x1d6   : > { %p2867_p9 = pneg %p2866_p12  ;;  %p2873_p10 = por %p2872_p0, %p2871_p6 }
 0x1d8   : > { %p2874_p1 = pnand %p2873_p10, %p2867_p9 }
 0x1da   : > { %2877 = shalt.err (!%p2874_p1)
}
 0x1db   : > { %p3965_p3 = scmp.ne.s32.totalorder %s3944_s10, 0  ;;  %s3966_s1 = sshll.u32 %s3366_s17, 3 }
 0x1dc   : > { %s660_s14 = scalar_lea.vmem [#allocation9], %s3966_s1  ;;  %s3967_s28 = sand.u32 1, %s3026_s26  }
 0x1dd   : > { %2314 = dma.hbm_to_vmem [thread:$0]  (!%p3965_p3), %s647_s23, 16, %s650_s6, %s3390_s5  }
 0x1de   : > { %s668_s13 = sshll.u32 %s660_s14, 4  ;;  %s657_s8 = scalar_lea.sflag [#allocation10], %s3967_s28  ;;  %s669_s13 = int_to_ptr.vmem [resolvable:$true] %s668_s13 }
 0x1df   : > { %s2878_s24 = scalar_lea.hbm %s3425_s2, 128  ;;  %s2883_s0 = scalar_lea.hbm %s3860_s3, 256 }
 0x1e0   : > { %p2879_p10 = scmp.ne.s32.totalorder %s3425_s2, %s2878_s24  ;;  %p2884_p2 = scmp.lt.u32.totalorder %s3425_s2, %s3860_s3 }
 0x1e1   : > { %p2885_p4 = scmp.lt.u32.totalorder %s2883_s0, %s2878_s24  ;;  %p2887_p8 = scmp.lt.u32.totalorder %s2878_s24, %s3425_s2 }
 0x1e2   : > { %p2881_p5 = pnand %p2879_p10, %p3962_p11 }
 0x1e3   : > { %p2886_p7 = por %p2885_p4, %p2884_p2 }
 0x1e4   : > { %p2882_p13 = pneg %p2881_p5 }
 0x1e5   : > { %p2888_p12 = por %p2887_p8, %p2886_p7 }
 0x1e7   : > { %p2889_p9 = pnand %p2888_p12, %p2882_p13 }
 0x1e9   : > { %2892 = shalt.err (!%p2889_p9)
}
 0x1ea   : > { %s2893_s5 = scalar_lea.vmem %s669_s13, 128  ;;  %s3045_s17 = smov [#allocation9]  }
 0x1eb   : > { %p2894_p6 = scmp.ne.s32.totalorder %s669_s13, %s2893_s5  ;;  %s2898_s6 = sshll.u32 %s3045_s17, 4  ;;  %s2899_s6 = int_to_ptr.vmem [resolvable:$false] %s2898_s6 }
 0x1ec   : > { %s2900_s23 = scalar_lea.vmem %s2899_s6, 256  ;;  %p2901_p10 = scmp.lt.s32.totalorder %s669_s13, %s2899_s6 }
 0x1ed   : > { %p2896_p0 = pnand %p2894_p6, %p3962_p11  ;;  %p2902_p5 = scmp.lt.s32.totalorder %s2900_s23, %s2893_s5 }
 0x1ef   : > { %p2897_p1 = pneg %p2896_p0  ;;  %p2903_p3 = por %p2902_p5, %p2901_p10 }
 0x1f1   : > { %p2904_p2 = pnand %p2903_p3, %p2897_p1 }
 0x1f3   : > { %2907 = shalt.err (!%p2904_p2)
}
 0x1f4   : > { %p3968_p4 = scmp.ne.s32.totalorder %s3944_s10, 0  ;;  %s3969_s7 = sld [smem:[#allocation43_spill]] }
 0x1f6   : > { %2317 = dma.hbm_to_vmem [thread:$0]  (!%p3968_p4), %s3425_s2, 128, %s669_s13, %s657_s8  }
 0x1fa   : > { %p3970_p13 = scmp.ne.s32.totalorder %s3969_s7, 0 }
 0x1fb   : > { %s3634_s9 = sand.u32 (!%p3970_p13), 1, %s3010_s22   ;;  %p3971_p11 = scmp.ne.s32.totalorder (!%p3970_p13), %s3939_s12, 0 }
 0x1fc   : > { %677 = sbr.rel (%p3970_p13) target bundleno = 3612 (0xe1c), region = 84  ;;  %s2025_s20 = sshll.u32 (!%p3970_p13), %s3634_s9, 2 }
 0x1fd   : > { %s680_s1 = scalar_lea.sflag (!%p3970_p13), [#allocation4], %s3634_s9  ;;  %s3638_s14 = scalar_lea.vmem (!%p3970_p13), [#allocation3], %s2025_s20 }
 0x203   : > { %2961 = dma.done.wait (%p3971_p11), %s680_s1, 64  }
 0x204   : > { %2963 = vsyncadd (%p3971_p11), %s680_s1, 4294967232  ;;  %s688_s10 = sand.u32 1, %s3177_s27   ;;  %s3646_s2 = sshll.u32 %s3634_s9, 3 }
 0x205   : > { %s689_s13 = scalar_lea.sflag [#allocation7], %s688_s10  ;;  %s692_s28 = scalar_lea.vmem [#allocation6], %s3646_s2 }
 0x206   : > { %2965 = dma.done.wait (%p3971_p11), %s689_s13, 144  }
 0x207   : > { %2967 = vsyncadd (%p3971_p11), %s689_s13, 4294967152  ;;  %s700_s8 = scalar_lea.vmem [#allocation8], %s3634_s9  ;;  %s706_s24 = scalar_lea.sflag [#allocation10], %s688_s10 }
 0x208   : > { %s709_s11 = scalar_lea.vmem [#allocation9], %s3646_s2 }
 0x209   : > { %2969 = dma.done.wait (%p3971_p11), %s706_s24, 128  }
 0x20a   : > { %2971 = vsyncadd (%p3971_p11), %s706_s24, 4294967168  ;;  %p3972_p3 = scmp.eq.s32.totalorder %s3177_s27, 0 }
 0x20c   : > { %2973 = dma.done.wait (%p3972_p3), [#allocation10], 256   ;;  %p3973_p7 = pmov %p3972_p3 }
 0x20d   : > { %p3974_p8 = pmov %p3972_p3 }
 0x20e   : > { %2975 = vsyncadd (%p3973_p7), [#allocation10], 4294967040 }
 0x20f   : > { %2977 = dma.done.wait (%p3974_p8), [#allocation13], 272   ;;  %p3975_p12 = pmov %p3972_p3 }
 0x210   : > { %p3976_p9 = pmov %p3972_p3 }
 0x211   : > { %2979 = vsyncadd (%p3975_p12), [#allocation13], 4294967024 }
 0x212   : > { %2981 = dma.done.wait (%p3976_p9), [#allocation16], 272   ;;  %p3977_p6 = pmov %p3972_p3 }
 0x213   : > { %p3978_p0 = pmov %p3972_p3 }
 0x214   : > { %2983 = vsyncadd (%p3977_p6), [#allocation16], 4294967024 }
 0x215   : > { %2985 = dma.done.wait (%p3978_p0), [#allocation19], 528   ;;  %p3979_p1 = pmov %p3978_p0 }
 0x216   : > { %p3980_p10 = pmov %p3978_p0 }
 0x217   : > { %2987 = vsyncadd (%p3979_p1), [#allocation19], 4294966768 }
 0x218   : > { %2989 = dma.done.wait (%p3980_p10), [#allocation22], 32   ;;  %p3981_p5 = pmov %p3978_p0 }
 0x219   : > { %p3982_p2 = pmov %p3978_p0 }
 0x21a   : > { %2991 = vsyncadd (%p3981_p5), [#allocation22], 4294967264 }
 0x21b   : > { %2993 = dma.done.wait (%p3982_p2), [#allocation25], 32   ;;  %p3983_p4 = pmov %p3978_p0 }
 0x21c   : > { %p3984_p13 = pmov %p3978_p0 }
 0x21d   : > { %2995 = vsyncadd (%p3983_p4), [#allocation25], 4294967264 }
 0x21e   : > { %2997 = dma.done.wait (%p3984_p13), [#allocation28], 16   ;;  %p3985_p11 = pmov %p3978_p0 }
 0x21f   : > { %v3046_v0 = vmov 0.0   ;;  %vm3047_vm0 = vmmov 0   ;;  %v2426_v1 = vld [vmem:[#allocation11] sm:$0xff]   ;;  %v2427_v2 = vld [vmem:[#allocation11 + $0x8] sm:$0xff]   ;;  %vm849_vm1 = vcmask 261120   ;;  %vm894_vm2 = vcmask 781312  }
 0x220   : > { %2999 = vsyncadd (%p3985_p11), [#allocation28], 4294967280  ;;  %2110 = vmatprep.subr.bf16.mxu1 %v3046_v0  ;;  %2114 = vmatprep.mubr.msk.bf16.mxu1 %vm3047_vm0, %v3046_v0  ;;  %v825_v3 = vld [vmem:[%s3638_s14] sm:$0xf]  ;;  %v2041_v4 = vld [vmem:[#allocation12] ss:$0 sm:$0xff] }
 0x221   : > { %2124 = vmatprep.subr.bf16.mxu0 %v3046_v0  ;;  %2126 = vmatprep.mubr.msk.bf16.mxu0 %vm3047_vm0, %v3046_v0  ;;  %s3048_s27 = smov 96   ;;  %s3049_s12 = smov 120   ;;  %vm915_vm3 = vcmask 64512   ;;  %v3718_v19 = vld [vmem:[%s700_s8] ss:$0 sm:$0xff]  ;;  %vm979_vm4 = vcmask 1043456  }
 0x222   : > { %2111 = vmatpush3.bf16.msra.mxu1 %v2426_v1  ;;  %s3050_s15 = smov 88   ;;  %s3051_s0 = smov 64   ;;  %v1024_v54 = vld [vmem:[#allocation14] sm:$0xf]  ;;  %v1140_v56 = vld [vmem:[#allocation14 + $0x4] sm:$0xf] }
 0x223   : > { %2112 = vmatprep.subr.bf16.mxu1 %v3046_v0  ;;  %s3052_s29 = smov 56   ;;  %s3053_s4 = smov 112   ;;  %v1191_v55 = vsel %vm979_vm4, %v1024_v54, 0  ;;  %v1145_v57 = vsel %vm979_vm4, %v1140_v56, 0  ;;  %vm1665_vm5 = vcmask 523264  }
 0x224   : > { %s3054_s5 = smov 80   ;;  %s3055_s17 = smov 72  }
 0x225   : > { %s3056_s6 = smov 104   ;;  %s3057_s23 = smov 48  }
 0x226   : > { %2113 = vmatpush3.bf16.msra.mxu1 %v2427_v2  ;;  %s3058_s7 = smov 40   ;;  %s3986_s20 = sld [smem:[#allocation42_spill]] }
 0x227   : > { %2118 = vmatprep.subr.bf16.mxu1 %v3046_v0  ;;  %s819_s14 = scalar_lea.vmem [#allocation29], %s3646_s2  ;;  %s3987_s8 = sld [smem:[#allocation62_spill]] }
 0x228   : > { %s1741_s10 = sshll.u32 %s819_s14, 4  ;;  %p3988_p7 = scmp.ne.s32.totalorder %s3940_s18, 0  ;;  %s3809_s10 = int_to_ptr.vmem [resolvable:$true] %s1741_s10 }
 0x229   : > { %2115 = vmatmul.mubr.msk.bf16.vlgmr.msra.gmra.mrb[0].mxu1 %vm849_vm1, %v825_v3  ;;  %s3060_s2 = smov [#allocation29]  }
 0x22a   : > { %2120 = vmatprep.mubr.msk.bf16.mxu1 %vm3047_vm0, %v3046_v0 }
 0x22c   : > { %s2072_s1 = sshll.u32 %s3986_s20, 7 }
 0x22d   : > { %s3807_s24 = scalar_lea.hbm %s3987_s8, %s2072_s1 }
 0x2fc   : > { %v887_v5 = vpop.f32.mrb[0].mxu1 }
 0x2fd   : > { %v888_v6 = vadd.f32 %v2041_v4, %v887_v5  ;;  %v2116_v7 = vpop.f32.mrb[1].mxu1 }
 0x2fe   : > { %v890_v8 = vpop.f32.mrb[2].mxu1 }
 0x2ff   : > { %v893_v9 = vpack.c.bf16 %v888_v6, %v888_v6  ;;  %v2117_v10 = vpop.f32.mrb[3].mxu1 }
 0x301   : > { %895 = vst.msk [vmem:[#allocation2] sm:$0xf] %vm894_vm2, %v893_v9 }
 0x308   : > { %v3699_v11 = vld [vmem:[#allocation2] ss:$0 sps:$4 sm:$0xff]  }
 0x309   : > { %v901_v12 = vld [vmem:[#allocation2] sm:$0xf]  ;;  %913 = vrot.lane.b32.xlu0 %v3699_v11, %s3048_s27  ;;  %s2908_s27 = scalar_lea.vmem %s3809_s10, 128 }
 0x30a   : > { %v3701_v13 = vcombine.low %v901_v12, %v901_v12  ;;  %p2909_p3 = scmp.ne.s32.totalorder %s3809_s10, %s2908_s27 }
 0x30c   : > { %1028 = vrot.lane.b32.xlu1 %v3701_v13, %s3049_s12  ;;  %p2910_p8 = pnand %p2909_p3, %p3988_p7  ;;  %s2912_s12 = sshll.u32 %s3060_s2, 4  ;;  %s2913_s12 = int_to_ptr.vmem [resolvable:$false] %s2912_s12 }
 0x30d   : > { %1030 = vrot.lane.b32.xlu0 %v3699_v11, %s3050_s15  ;;  %s2914_s15 = scalar_lea.vmem %s2913_s12, 256  ;;  %p2915_p9 = scmp.lt.s32.totalorder %s3809_s10, %s2913_s12 }
 0x30e   : > { %p2911_p12 = pneg %p2910_p8  ;;  %p2916_p6 = scmp.lt.s32.totalorder %s2914_s15, %s2908_s27 }
 0x310   : > { %p2917_p0 = por %p2916_p6, %p2915_p9 }
 0x312   : > { %p2918_p1 = pnand %p2917_p0, %p2911_p12 }
 0x37b   : > { %v914_v14 = vpop.permute.xlu0 %913 }
 0x37c   : > { %v920_v15 = vsel %vm915_vm3, %v914_v14, 0 }
 0x37d   : > { %2119 = vmatpush3.bf16.xpose.msra.mxu1 %v920_v15 }
 0x37e   : > { %2130 = vmatprep.subr.bf16.mxu1 %v3046_v0  ;;  %v1029_v18 = vpop.permute.xlu1 %1028 }
 0x37f   : > { %v1031_v16 = vpop.permute.xlu0 %1030 }
 0x380   : > { %v1036_v17 = vsel %vm915_vm3, %v1031_v16, 0 }
 0x384   : > { %2121 = vmatmul.mubr.msk.bf16.vlgmr.msra.gmra.mrb[4].mxu1 %vm915_vm3, %v901_v12 }
 0x385   : > { %2131 = vmatpush3.bf16.xpose.msra.mxu1 %v1036_v17  ;;  %2132 = vmatprep.mubr.msk.bf16.mxu1 %vm3047_vm0, %v3046_v0 }
 0x386   : > { %2142 = vmatprep.subr.bf16.mxu1 %v3046_v0 }
 0x38c   : > { %2133 = vmatmul.mubr.msk.bf16.vlgmr.msra.gmra.mrb[8].mxu1 %vm915_vm3, %v1029_v18 }
 0x38d   : > { %2144 = vmatprep.mubr.msk.bf16.mxu1 %vm3047_vm0, %v3046_v0  ;;  %2143 = vmatpush3.bf16.msra.mxu1 %v1145_v57 }
 0x38e   : > { %2154 = vmatprep.subr.bf16.mxu1 %v3046_v0 }
 0x457   : > { %v956_v20 = vpop.f32.mrb[4].mxu1 }
 0x458   : > { %v957_v21 = vadd.f32 %v3718_v19, %v956_v20  ;;  %v2122_v22 = vpop.f32.mrb[5].mxu1 }
 0x459   : > { %v959_v23 = vpop.f32.mrb[6].mxu1 }
 0x45a   : > { %v2123_v24 = vpop.f32.mrb[7].mxu1  ;;  %v962_v25 = vsel %vm915_vm3, %v957_v21, -inf }
 0x45b   : > { %963 = vmax.xlane.f32.xlu1 %v962_v25 }
 0x45f   : > { %v1072_v26 = vpop.f32.mrb[8].mxu1 }
 0x460   : > { %v1073_v27 = vadd.f32 %v3718_v19, %v1072_v26  ;;  %v2134_v28 = vpop.f32.mrb[9].mxu1 }
 0x461   : > { %v1075_v29 = vpop.f32.mrb[10].mxu1 }
 0x462   : > { %v2135_v30 = vpop.f32.mrb[11].mxu1  ;;  %v1078_v31 = vsel %vm915_vm3, %v1073_v27, -inf }
 0x463   : > { %1079 = vmax.xlane.f32.xlu0 %v1078_v31 }
 0x4e8   : > { %v964_v32 = vpop.xlane.xlu1 %963 }
 0x4e9   : > { %v965_v33 = vsub.f32 %v957_v21, %v964_v32 }
 0x4eb   : > { %v966_v34 = vmul.f32 1.442695, %v965_v33 }
 0x4ed   : > { %2436 = vpow2.f32 %v966_v34 }
 0x4f0   : > { %v1080_v35 = vpop.xlane.xlu0 %1079 }
 0x4f1   : > { %v1081_v36 = vsub.f32 %v1073_v27, %v1080_v35 }
 0x4f3   : > { %v1082_v37 = vmul.f32 1.442695, %v1081_v36 }
 0x4f5   : > { %2438 = vpow2.f32 %v1082_v37 }
 0x4f7   : > { %v2437_v38 = vpop.eup %2436 }
 0x4f8   : > { %v968_v39 = vsel %vm915_vm3, %v2437_v38, 0.0 }
 0x4f9   : > { %969 = vadd.xlane.f32.xlu0 %v968_v39  ;;  %v1345_v39 = vld [vmem:[#allocation14 + $0x8] sm:$0xf] }
 0x4ff   : > { %v2439_v40 = vpop.eup %2438 }
 0x500   : > { %v1084_v41 = vsel %vm915_vm3, %v2439_v40, 0.0 }
 0x501   : > { %1085 = vadd.xlane.f32.xlu1 %v1084_v41 }
 0x50f   : > { %974 = vrot.lane.b32.xlu0 %v3699_v11, %s3051_s0 }
 0x512   : > { %1090 = vrot.lane.b32.xlu1 %v3699_v11, %s3052_s29 }
 0x513   : > { %1233 = vrot.lane.b32.xlu0 %v3701_v13, %s3053_s4 }
 0x516   : > { %1235 = vrot.lane.b32.xlu1 %v3699_v11, %s3054_s5 }
 0x586   : > { %v970_v42 = vpop.xlane.xlu0 %969 }
 0x587   : > { %2440 = vrcp.f32 %v970_v42 }
 0x58a   : > { %v975_v43 = vpop.permute.xlu0 %974 }
 0x58b   : > { %v981_v44 = vsel %vm979_vm4, %v975_v43, 0 }
 0x58c   : > { %2125 = vmatpush3.bf16.msra.mxu0 %v981_v44 }
 0x58d   : > { %2136 = vmatprep.subr.bf16.mxu0 %v3046_v0 }
 0x58e   : > { %v1086_v45 = vpop.xlane.xlu1 %1085  ;;  %v1234_v7 = vpop.permute.xlu0 %1233 }
 0x58f   : > { %2442 = vrcp.f32 %v1086_v45 }
 0x591   : > { %v2441_v46 = vpop.eup %2440 }
 0x592   : > { %v972_v47 = vmul.f32 %v2441_v46, %v2437_v38  ;;  %v1091_v48 = vpop.permute.xlu1 %1090 }
 0x593   : > { %v1096_v50 = vsel %vm979_vm4, %v1091_v48, 0 }
 0x594   : > { %v973_v49 = vpack.c.bf16 %v972_v47, %v972_v47 }
 0x596   : > { %2127 = vmatmul.mubr.msk.bf16.vlgmr.msra.gmra.mrb[0].mxu0 %vm915_vm3, %v973_v49  ;;  %v1236_v63 = vpop.permute.xlu1 %1235 }
 0x597   : > { %2137 = vmatpush3.bf16.msra.mxu0 %v1096_v50  ;;  %2138 = vmatprep.mubr.msk.bf16.mxu0 %vm3047_vm0, %v3046_v0  ;;  %v1241_v5 = vsel %vm915_vm3, %v1236_v63, 0 }
 0x598   : > { %2148 = vmatprep.subr.bf16.mxu0 %v3046_v0 }
 0x599   : > { %v2443_v51 = vpop.eup %2442 }
 0x59a   : > { %v1088_v52 = vmul.f32 %v2443_v51, %v2439_v40  ;;  %v1350_v40 = vsel %vm979_vm4, %v1345_v39, 0 }
 0x59c   : > { %v1089_v53 = vpack.c.bf16 %v1088_v52, %v1088_v52 }
 0x59e   : > { %2139 = vmatmul.mubr.msk.bf16.vlgmr.msra.gmra.mrb[4].mxu0 %vm915_vm3, %v1089_v53 }
 0x59f   : > { %2150 = vmatprep.mubr.msk.bf16.mxu0 %vm3047_vm0, %v3046_v0  ;;  %2149 = vmatpush3.bf16.msra.mxu0 %v1191_v55 }
 0x5a0   : > { %2160 = vmatprep.subr.bf16.mxu0 %v3046_v0 }
 0x669   : > { %v1017_v58 = vpop.f32.mrb[0].mxu0 }
 0x66a   : > { %v1023_v59 = vpack.c.bf16 %v1017_v58, %v1017_v58  ;;  %v2128_v60 = vpop.f32.mrb[1].mxu0  ;;  %v1505_v58 = vld [vmem:[#allocation14 + $0xc] sm:$0xf] }
 0x66b   : > { %v1020_v61 = vpop.f32.mrb[2].mxu0 }
 0x66c   : > { %v2129_v62 = vpop.f32.mrb[3].mxu0  ;;  %2151 = vmatmul.mubr.msk.bf16.vlgmr.msra.gmra.mrb[8].mxu0 %vm915_vm3, %v1023_v59  ;;  %v1510_v59 = vsel %vm979_vm4, %v1505_v58, 0 }
 0x66d   : > { %2162 = vmatprep.mubr.msk.bf16.mxu0 %vm3047_vm0, %v3046_v0 }
 0x671   : > { %v1132_v1 = vpop.f32.mrb[4].mxu0 }
 0x672   : > { %v1138_v2 = vpack.c.bf16 %v1132_v1, %v1132_v1  ;;  %v2140_v3 = vpop.f32.mrb[5].mxu0 }
 0x673   : > { %v1135_v4 = vpop.f32.mrb[6].mxu0 }
 0x674   : > { %v2141_v6 = vpop.f32.mrb[7].mxu0  ;;  %2145 = vmatmul.mubr.msk.bf16.vlgmr.msra.gmra.mrb[12].mxu1 %vm915_vm3, %v1138_v2 }
 0x675   : > { %2155 = vmatpush3.bf16.xpose.msra.mxu1 %v1241_v5  ;;  %2156 = vmatprep.mubr.msk.bf16.mxu1 %vm3047_vm0, %v3046_v0 }
 0x676   : > { %2166 = vmatprep.subr.bf16.mxu1 %v3046_v0 }
 0x67c   : > { %2157 = vmatmul.mubr.msk.bf16.vlgmr.msra.gmra.mrb[16].mxu1 %vm915_vm3, %v1234_v7 }
 0x67d   : > { %2168 = vmatprep.mubr.msk.bf16.mxu1 %vm3047_vm0, %v3046_v0  ;;  %2167 = vmatpush3.bf16.msra.mxu1 %v1350_v40 }
 0x67e   : > { %2178 = vmatprep.subr.bf16.mxu1 %v3046_v0 }
 0x73f   : > { %v1227_v8 = vpop.f32.mrb[8].mxu0 }
 0x740   : > { %v2152_v9 = vpop.f32.mrb[9].mxu0 }
 0x741   : > { %v1230_v10 = vpop.f32.mrb[10].mxu0 }
 0x742   : > { %v2153_v12 = vpop.f32.mrb[11].mxu0  ;;  %v2430_v10 = vld [vmem:[#allocation17] sm:$0xff]  }
 0x743   : > { %v2431_v12 = vld [vmem:[#allocation17 + $0x8] sm:$0xff]  }
 0x747   : > { %v1181_v14 = vpop.f32.mrb[12].mxu1 }
 0x748   : > { %v3755_v15 = vadd.f32 %v1227_v8, %v1181_v14  ;;  %v2146_v16 = vpop.f32.mrb[13].mxu1  ;;  %v2432_v14 = vld [vmem:[#allocation20] sm:$0xff]  }
 0x749   : > { %v1184_v17 = vpop.f32.mrb[14].mxu1 }
 0x74a   : > { %v2147_v18 = vpop.f32.mrb[15].mxu1  ;;  %v2060_v17 = vld [vmem:[#allocation15] ss:$0 sm:$0xff] }
 0x74f   : > { %v1277_v20 = vpop.f32.mrb[16].mxu1 }
 0x750   : > { %v1278_v21 = vadd.f32 %v3718_v19, %v1277_v20  ;;  %v2158_v22 = vpop.f32.mrb[17].mxu1 }
 0x751   : > { %v1280_v23 = vpop.f32.mrb[18].mxu1 }
 0x752   : > { %v2159_v24 = vpop.f32.mrb[19].mxu1  ;;  %v1283_v25 = vsel %vm915_vm3, %v1278_v21, -inf }
 0x753   : > { %1284 = vmax.xlane.f32.xlu1 %v1283_v25 }
 0x764   : > { %1395 = vrot.lane.b32.xlu1 %v3699_v11, %s3055_s17 }
 0x768   : > { %1393 = vrot.lane.b32.xlu1 %v3701_v13, %s3056_s6 }
 0x7e0   : > { %v1285_v26 = vpop.xlane.xlu1 %1284 }
 0x7e1   : > { %v1286_v27 = vsub.f32 %v1278_v21, %v1285_v26  ;;  %v1561_v21 = vld [vmem:[%s692_s28] sm:$0xff] }
 0x7e3   : > { %v1287_v28 = vmul.f32 1.442695, %v1286_v27  ;;  %v2434_v27 = vld [vmem:[#allocation20 + $0x10] sm:$0xff]  }
 0x7e4   : > { %v1396_v35 = vpop.permute.xlu1 %1395 }
 0x7e5   : > { %2444 = vpow2.f32 %v1287_v28  ;;  %v1401_v37 = vsel %vm915_vm3, %v1396_v35, 0  ;;  %v2435_v28 = vld [vmem:[#allocation20 + $0x18] sm:$0xff]  }
 0x7e8   : > { %v1394_v38 = vpop.permute.xlu1 %1393 }
 0x7ef   : > { %v2445_v29 = vpop.eup %2444 }
 0x7f0   : > { %v1289_v30 = vsel %vm915_vm3, %v2445_v29, 0.0 }
 0x7f1   : > { %1290 = vadd.xlane.f32.xlu0 %v1289_v30  ;;  %v3059_v30 = vmov 0  }
 0x7f2   : > { %2424 = vset.pattern.permute.xlu1 %v3059_v30  ;;  %2425 = vset.pattern.permute.xlu0 %v3059_v30 }
 0x807   : > { %1295 = vrot.lane.b32.xlu0 %v3699_v11, %s3057_s23 }
 0x87e   : > { %v1291_v31 = vpop.xlane.xlu0 %1290 }
 0x87f   : > { %2446 = vrcp.f32 %v1291_v31  ;;  %v2061_v31 = vld [vmem:[#allocation18] ss:$0 sm:$0xff] }
 0x882   : > { %v1296_v32 = vpop.permute.xlu0 %1295 }
 0x883   : > { %v1301_v33 = vsel %vm979_vm4, %v1296_v32, 0 }
 0x884   : > { %2161 = vmatpush3.bf16.msra.mxu0 %v1301_v33 }
 0x885   : > { %2172 = vmatprep.subr.bf16.mxu0 %v3046_v0 }
 0x889   : > { %v2447_v13 = vpop.eup %2446 }
 0x88a   : > { %v1293_v34 = vmul.f32 %v2447_v13, %v2445_v29  ;;  %v1718_v29 = vld [vmem:[%s709_s11] sm:$0xff]  ;;  %s1727_s11 = scalar_lea.sflag [#allocation5], %s3634_s9 }
 0x88c   : > { %v1294_v36 = vpack.c.bf16 %v1293_v34, %v1293_v34 }
 0x88e   : > { %2163 = vmatmul.mubr.msk.bf16.vlgmr.msra.gmra.mrb[12].mxu0 %vm915_vm3, %v1294_v36 }
 0x88f   : > { %2173 = vmatpush3.bf16.xpose.msra.mxu0 %v1401_v37  ;;  %2174 = vmatprep.mubr.msk.bf16.mxu0 %vm3047_vm0, %v3046_v0 }
 0x890   : > { %2184 = vmatprep.subr.bf16.mxu0 %v3046_v0 }
 0x896   : > { %2175 = vmatmul.mubr.msk.bf16.vlgmr.msra.gmra.mrb[16].mxu0 %vm915_vm3, %v1394_v38  ;;  %v2070_v38 = vld [vmem:[#allocation21] ss:$0 sm:$0xff] }
 0x897   : > { %2186 = vmatprep.mubr.msk.bf16.mxu0 %vm3047_vm0, %v3046_v0  ;;  %2185 = vmatpush3.bf16.msra.mxu0 %v1510_v59 }
 0x898   : > { %2198 = vmatprep.subr.bf16.mxu0 %v3046_v0 }
 0x961   : > { %v1337_v41 = vpop.f32.mrb[12].mxu0 }
 0x962   : > { %v1343_v42 = vpack.c.bf16 %v1337_v41, %v1337_v41  ;;  %v2164_v43 = vpop.f32.mrb[13].mxu0 }
 0x963   : > { %v1340_v44 = vpop.f32.mrb[14].mxu0 }
 0x964   : > { %v2165_v45 = vpop.f32.mrb[15].mxu0  ;;  %2169 = vmatmul.mubr.msk.bf16.vlgmr.msra.gmra.mrb[20].mxu1 %vm915_vm3, %v1343_v42 }
 0x965   : > { %2180 = vmatprep.mubr.msk.bf16.mxu1 %vm3047_vm0, %v3046_v0 }
 0x969   : > { %v1437_v46 = vpop.f32.mrb[16].mxu0 }
 0x96a   : > { %v1438_v47 = vadd.f32 %v3718_v19, %v1437_v46  ;;  %v2176_v48 = vpop.f32.mrb[17].mxu0 }
 0x96b   : > { %v1440_v49 = vpop.f32.mrb[18].mxu0 }
 0x96c   : > { %v2177_v50 = vpop.f32.mrb[19].mxu0  ;;  %v1443_v51 = vsel %vm915_vm3, %v1438_v47, -inf }
 0x96d   : > { %1444 = vmax.xlane.f32.xlu0 %v1443_v51 }
 0x983   : > { %1455 = vrot.lane.b32.xlu0 %v3699_v11, %s3058_s7 }
 0x9fa   : > { %v1445_v52 = vpop.xlane.xlu0 %1444 }
 0x9fb   : > { %v1446_v53 = vsub.f32 %v1438_v47, %v1445_v52 }
 0x9fd   : > { %v1447_v54 = vmul.f32 1.442695, %v1446_v53 }
 0x9fe   : > { %v1456_v55 = vpop.permute.xlu0 %1455 }
 0x9ff   : > { %2448 = vpow2.f32 %v1447_v54  ;;  %v1461_v56 = vsel %vm979_vm4, %v1456_v55, 0 }
 0xa00   : > { %2179 = vmatpush3.bf16.msra.mxu1 %v1461_v56 }
 0xa01   : > { %2190 = vmatprep.subr.bf16.mxu1 %v3046_v0 }
 0xa09   : > { %v2449_v19 = vpop.eup %2448 }
 0xa0a   : > { %v1449_v57 = vsel %vm915_vm3, %v2449_v19, 0.0 }
 0xa0b   : > { %1450 = vadd.xlane.f32.xlu1 %v1449_v57 }
 0xa1c   : > { %1721 = vperm.xlu1 %2424, %v1718_v29  }
 0xa37   : > { %v1386_v11 = vpop.f32.mrb[20].mxu1 }
 0xa38   : > { %v1392_v60 = vadd.f32 %v1386_v11, %v3755_v15  ;;  %v2170_v61 = vpop.f32.mrb[21].mxu1  ;;  %v2433_v15 = vld [vmem:[#allocation20 + $0x8] sm:$0xff]  }
 0xa39   : > { %v1389_v62 = vpop.f32.mrb[22].mxu1 }
 0xa3a   : > { %v2171_v63 = vpop.f32.mrb[23].mxu1 }
 0xa98   : > { %v1451_v1 = vpop.xlane.xlu1 %1450 }
 0xa99   : > { %2450 = vrcp.f32 %v1451_v1 }
 0xa9c   : > { %v1722_v42 = vpop.permute.xlu1 %1721 }
 0xaa3   : > { %v2451_v2 = vpop.eup %2450 }
 0xaa4   : > { %v1453_v3 = vmul.f32 %v2451_v2, %v2449_v19 }
 0xaa6   : > { %v1454_v4 = vpack.c.bf16 %v1453_v3, %v1453_v3 }
 0xaa8   : > { %2181 = vmatmul.mubr.msk.bf16.vlgmr.msra.gmra.mrb[24].mxu1 %vm915_vm3, %v1454_v4 }
 0xaa9   : > { %2194 = vmatprep.mubr.msk.bf16.mxu1 %vm3047_vm0, %v3046_v0  ;;  %2191 = vmatpush3.bf16.msra.mxu1 %v2430_v10 }
 0xaaa   : > { %2192 = vmatprep.subr.bf16.mxu1 %v3046_v0 }
 0xaad   : > { %2193 = vmatpush3.bf16.msra.mxu1 %v2431_v12 }
 0xb7b   : > { %v1497_v5 = vpop.f32.mrb[24].mxu1 }
 0xb7c   : > { %v1503_v6 = vpack.c.bf16 %v1497_v5, %v1497_v5  ;;  %v2182_v7 = vpop.f32.mrb[25].mxu1 }
 0xb7d   : > { %v1500_v8 = vpop.f32.mrb[26].mxu1 }
 0xb7e   : > { %v2183_v9 = vpop.f32.mrb[27].mxu1  ;;  %2187 = vmatmul.mubr.msk.bf16.vlgmr.msra.gmra.mrb[20].mxu0 %vm915_vm3, %v1503_v6 }
 0xb7f   : > { %2206 = vmatprep.mubr.msk.bf16.mxu0 %vm3047_vm0, %v3046_v0  ;;  %2199 = vmatpush3.bf16.msra.mxu0 %v2432_v14 }
 0xb80   : > { %2200 = vmatprep.subr.bf16.mxu0 %v3046_v0 }
 0xb83   : > { %2201 = vmatpush3.bf16.msra.mxu0 %v2433_v15 }
 0xb84   : > { %2202 = vmatprep.subr.bf16.mxu0 %v3046_v0 }
 0xb87   : > { %2203 = vmatpush3.bf16.msra.mxu0 %v2434_v27 }
 0xb88   : > { %2204 = vmatprep.subr.bf16.mxu0 %v3046_v0 }
 0xb8b   : > { %2205 = vmatpush3.bf16.msra.mxu0 %v2435_v28 }
 0xc51   : > { %v1546_v16 = vpop.f32.mrb[20].mxu0 }
 0xc52   : > { %v1552_v18 = vadd.f32 %v1546_v16, %v1392_v60  ;;  %v2188_v20 = vpop.f32.mrb[21].mxu0 }
 0xc53   : > { %v1549_v22 = vpop.f32.mrb[22].mxu0 }
 0xc54   : > { %v1560_v23 = vadd.f32 %v2060_v17, %v1552_v18  ;;  %v2189_v24 = vpop.f32.mrb[23].mxu0 }
 0xc56   : > { %v1562_v25 = vadd.f32 %v1561_v21, %v1560_v23 }
 0xc58   : > { %v1563_v26 = vpack.c.bf16 %v1562_v25, %v1562_v25 }
 0xc5a   : > { %2195 = vmatmul.mubr.msk.bf16.vlgmr.msra.gmra.mrb[28].mxu1 %vm849_vm1, %v1563_v26 }
 0xd2d   : > { %v1625_v32 = vpop.f32.mrb[28].mxu1 }
 0xd2e   : > { %v1626_v33 = vadd.f32 %v2061_v31, %v1625_v32  ;;  %v2196_v13 = vpop.f32.mrb[29].mxu1 }
 0xd2f   : > { %v1628_v34 = vpop.f32.mrb[30].mxu1 }
 0xd30   : > { %v1631_v35 = vmax.f32 %v1626_v33, 0.0  ;;  %v2197_v36 = vpop.f32.mrb[31].mxu1 }
 0xd32   : > { %v1632_v37 = vpack.c.bf16 %v1631_v35, %v1631_v35 }
 0xd34   : > { %2207 = vmatmul.mubr.msk.bf16.vlgmr.msra.gmra.mrb[24].mxu0 %vm1665_vm5, %v1632_v37 }
 0xe07   : > { %v1703_v0 = vpop.f32.mrb[24].mxu0 }
 0xe08   : > { %v1709_v39 = vadd.f32 %v1703_v0, %v1562_v25  ;;  %v2208_v40 = vpop.f32.mrb[25].mxu0 }
 0xe09   : > { %v1706_v41 = vpop.f32.mrb[26].mxu0 }
 0xe0a   : > { %v2209_v43 = vpop.f32.mrb[27].mxu0  ;;  %v1717_v44 = vadd.f32 %v2070_v38, %v1709_v39 }
 0xe0c   : > { %v1724_v45 = vmul.f32 %v1722_v42, %v1717_v44 }
 0xe0e   : > { %1725 = vst.msk [vmem:[%s819_s14] sm:$0xff] %vm849_vm1, %v1724_v45 }
 0xe0f   : > { %2921 = shalt.err (!%p2918_p1)
}
 0xe10   : > { %s2922_s9 = scalar_lea.hbm %s3807_s24, 128  ;;  %s2926_s4 = scalar_lea.hbm %s3987_s8, 256 }
 0xe11   : > { %p2923_p10 = scmp.ne.s32.totalorder %s3807_s24, %s2922_s9  ;;  %p2927_p4 = scmp.lt.u32.totalorder %s3807_s24, %s3987_s8 }
 0xe12   : > { %p2928_p13 = scmp.lt.u32.totalorder %s2926_s4, %s2922_s9  ;;  %p2930_p3 = scmp.lt.u32.totalorder %s2922_s9, %s3807_s24 }
 0xe13   : > { %p2924_p5 = pnand %p2923_p10, %p3988_p7 }
 0xe14   : > { %p2929_p11 = por %p2928_p13, %p2927_p4 }
 0xe15   : > { %p2925_p2 = pneg %p2924_p5 }
 0xe16   : > { %p2931_p8 = por %p2930_p3, %p2929_p11 }
 0xe18   : > { %p2932_p12 = pnand %p2931_p8, %p2925_p2 }
 0xe1a   : > { %2935 = shalt.err (!%p2932_p12)
}
 0xe1b   : > { %2266 = dma.vmem_to_hbm [thread:$0]  (%p3988_p7), %s3809_s10, 128, %s3807_s24, %s1727_s11  }
 0xe1c PF: > { %s3989_s6 = sld [smem:[#allocation46_spill]]  ;;  %s1753_s23 = sand.u32 1, %s3006_s21  }
 0xe1d   : > { %p3991_p6 = scmp.ge.s32.totalorder %s3026_s26, 2  ;;  %s1754_s7 = scalar_lea.sflag [#allocation5], %s1753_s23 }
 0xe22   : > { %p3990_p9 = scmp.ne.s32.totalorder %s3989_s6, 0 }
 0xe24   : > { %p2319_p0 = pnand %p3991_p6, %p3990_p9 }
 0xe26   : > { %3001 = dma.done.wait (!%p2319_p0), %s1754_s7, 128  }
 0xe27   : > { %3003 = vsyncadd (!%p2319_p0), %s1754_s7, 4294967168  ;;  %s44_s26 = sadd.s32 1, %s3026_s26   ;;  %s3992_s20 = sld [smem:[#allocation41_spill]] }
 0xe28   : > { %p41_p1 = scmp.ge.s32.totalorder %s44_s26, 4   ;;  %s3993_s23 = sld [smem:[#allocation45_spill]] }
 0xe29   : > { %s3994_s18 = sld [smem:[#allocation44_spill]]  ;;  %s3995_s21 = smov %s3010_s22 }
 0xe2a   : > { %s3997_s24 = smov %s3022_s25  ;;  %43 = sbr.rel (!%p41_p1) target bundleno = 33 (0x21), region = 222 }
 0xe2d   : > { %s3996_s22 = smov %s3992_s20 }
 0xe2f   : > { %s3998_s25 = smov %s3994_s18 }
 0xe31   :  { %1759 = vsyncpa [#allocation4], 1 }
 0xe32   :  { %1761 = vsyncpa [#allocation4 + $0x1], 1 }
 0xe33   :  { %1762 = vsyncpa [#allocation7], 1 }
 0xe34   :  { %1764 = vsyncpa [#allocation7 + $0x1], 1 }
 0xe35   :  { %1765 = vsyncpa [#allocation10], 1 }
 0xe36   :  { %1767 = vsyncpa [#allocation10 + $0x1], 1 }
 0xe37   :  { %1768 = vsyncpa [#allocation13], 1 }
 0xe38   :  { %1769 = vsyncpa [#allocation16], 1 }
 0xe39   :  { %1770 = vsyncpa [#allocation19], 1 }
 0xe3a   :  { %1771 = vsyncpa [#allocation22], 1 }
 0xe3b   :  { %1772 = vsyncpa [#allocation25], 1 }
 0xe3c   :  { %1773 = vsyncpa [#allocation28], 1 }
 0xe3d   :  { %1774 = vsyncpa [#allocation5], 1 }
 0xe3e   :  { %1776 = vsyncpa [#allocation5 + $0x1], 1 }

</bundles_post_ra>
